<compile_context>
chip_gen: v6e
topology: v6e:2x2x1
jax: 0.10.0
libtpu: 0.0.40
codegen_flags: <defaults>
</compile_context>

<pallas_src>
import jax
import jax.numpy as jnp
from jax import lax
from jax.experimental import pallas as pl
from jax.experimental.pallas import tpu as pltpu


OUT_LANES = 128                 # lane-dense packed output width
MXU_DTYPE = jnp.bfloat16        # MXU operand dtype (f32 accumulate everywhere)


def _round_up(x, m):
    return (x + m - 1) // m * m


# ----------------------------------------------------------------------------
# Fused encoder + decoder kernel (single invocation, no grid)
# ----------------------------------------------------------------------------
def seq2seq_kernel(xg_ref, yg_ref, tgt_ref,
                   whe_ref, whd_ref, wp_ref, bp_ref,
                   out_ref, cbuf_ref):
    f32 = jnp.float32
    B = out_ref.shape[0]                 # padded batch (multiple of 8)
    H = whe_ref.shape[0]                 # hidden dim
    Vp = wp_ref.shape[1]                 # padded vocab (multiple of 128)
    T_in = xg_ref.shape[0] // B
    T_dec = yg_ref.shape[0] // B
    OUT_L = out_ref.shape[1]

    xg = xg_ref[...]                     # (T_in*B, 4H) f32, bias fused, g-cols x2
    yg = yg_ref[...]                     # (T_dec*B, 4H) f32
    whe = whe_ref[...]                   # (H, 4H) bf16 (g-cols x2)
    whd = whd_ref[...]                   # (H, 4H) bf16 (g-cols x2)
    wp = wp_ref[...]                     # (H, Vp)  bf16, padded cols zero
    bp = bp_ref[...]                     # (1, Vp)  f32, padded lanes -1e30

    def lstm_cell(gate_in, h, c, whh):
        # gate_in already holds x @ W_ih^T + b_ih + b_hh (g columns pre-scaled x2)
        gates = gate_in + jnp.dot(h.astype(whh.dtype), whh,
                                  preferred_element_type=f32)      # f32 accumulate
        sg = jax.nn.sigmoid(gates)            # ONE full-vreg EUP pass (4H = 128 lanes)
        i = sg[:, 0 * H:1 * H]
        f = sg[:, 1 * H:2 * H]
        g = 2.0 * sg[:, 2 * H:3 * H] - 1.0    # tanh(x) = 2*sigmoid(2x) - 1
        o = sg[:, 3 * H:4 * H]
        c_new = f * c + i * g
        h_new = o * jnp.tanh(c_new)
        return h_new, c_new

    h = jnp.zeros((B, H), f32)
    c = jnp.zeros((B, H), f32)

    # ---- encoder recurrence (static unroll, T_in is small) ----
    for t in range(T_in):
        h, c = lstm_cell(xg[t * B:(t + 1) * B, :], h, c, whe)

    # ---- decoder recurrence (teacher forcing); stash cell states ----
    for t in range(T_dec):
        h, c = lstm_cell(yg[t * B:(t + 1) * B, :], h, c, whd)
        cbuf_ref[t * B:(t + 1) * B, :] = c

    # ---- batched epilogue: one projection + one softmax/argmax pass ----
    c_all = cbuf_ref[...]                                         # (T_dec*B, H)
    # PyTorch model projects the CELL state (quirk kept).
    logits = jnp.dot(c_all.astype(wp.dtype), wp,
                     preferred_element_type=f32) + bp             # (N, Vp) f32

    N = T_dec * B
    lane_iota = lax.broadcasted_iota(jnp.int32, (N, Vp), 1)
    maxv = jnp.max(logits, axis=-1, keepdims=True)                # (N, 1)
    # first-occurrence argmax (same tie-breaking as torch.argmax)
    greedy = jnp.min(jnp.where(logits == maxv, lane_iota, Vp),
                     axis=-1, keepdims=True)                      # (N, 1) i32
    lse = maxv + jnp.log(jnp.sum(jnp.exp(logits - maxv),
                                 axis=-1, keepdims=True))         # (N, 1)
    tgt = tgt_ref[...]                                            # (N, 1) i32
    tgt_logit = jnp.sum(jnp.where(lane_iota == tgt, logits, 0.0),
                        axis=-1, keepdims=True)                   # (N, 1)
    lp = tgt_logit - lse                                          # (N, 1)

    # ---- pack both outputs into one lane-dense (B, 128) slab, store once ----
    out_iota = lax.broadcasted_iota(jnp.int32, (B, OUT_L), 1)
    out = jnp.zeros((B, OUT_L), f32)
    clp = jnp.zeros((B, 1), f32)
    greedy_f = greedy.astype(f32)                                 # exact (< 2^24)
    for t in range(T_dec):
        out = jnp.where(out_iota == t, greedy_f[t * B:(t + 1) * B, :], out)
        clp = clp + lp[t * B:(t + 1) * B, :]
    out = jnp.where(out_iota == T_dec, clp, out)
    out_ref[...] = out


def run_seq2seq(xg, yg, tgt, whe, whd, wp, bp, B_pad, T_dec, H):
    vmem = pl.BlockSpec(memory_space=pltpu.MemorySpace.VMEM)
    return pl.pallas_call(
        seq2seq_kernel,
        out_shape=jax.ShapeDtypeStruct((B_pad, OUT_LANES), jnp.float32),
        in_specs=[vmem] * 7,
        out_specs=vmem,
        scratch_shapes=[pltpu.VMEM((T_dec * B_pad, H), jnp.float32)],
    )(xg, yg, tgt, whe, whd, wp, bp)


# ----------------------------------------------------------------------------
# Model wrapper (parameter setup + glue in plain JAX)
# ----------------------------------------------------------------------------
def init_params(key, num_input_tokens, num_output_tokens,
                input_embedding_dim, output_embedding_dim, hidden_dim):
    ks = jax.random.split(key, 12)
    s = 1.0 / jnp.sqrt(hidden_dim)
    u = lambda k, shape: jax.random.uniform(k, shape, jnp.float32, -s, s)
    return {
        "in_emb": jax.random.normal(ks[0], (num_input_tokens, input_embedding_dim), jnp.float32),
        "out_emb": jax.random.normal(ks[1], (num_output_tokens, output_embedding_dim), jnp.float32),
        "enc_w_ih": u(ks[2], (4 * hidden_dim, input_embedding_dim)),
        "enc_w_hh": u(ks[3], (4 * hidden_dim, hidden_dim)),
        "enc_b_ih": u(ks[4], (4 * hidden_dim,)),
        "enc_b_hh": u(ks[5], (4 * hidden_dim,)),
        "dec_w_ih": u(ks[6], (4 * hidden_dim, output_embedding_dim)),
        "dec_w_hh": u(ks[7], (4 * hidden_dim, hidden_dim)),
        "dec_b_ih": u(ks[8], (4 * hidden_dim,)),
        "dec_b_hh": u(ks[9], (4 * hidden_dim,)),
        "proj_w": u(ks[10], (num_output_tokens, hidden_dim)),
        "proj_b": u(ks[11], (num_output_tokens,)),
    }


@jax.jit
def forward_pallas(params, input_tensor, output_tensor):
    """Teacher-forcing forward pass.

    input_tensor:  (B, T_in)  int32 (already padded with input_end_token)
    output_tensor: (B, T_out) int32 (padded with input_end_token, PyTorch quirk)
    Returns: greedy tokens (B, T_out-1) int32, cum_log_probs (B,) f32.
    """
    B, T_in = input_tensor.shape
    T_out = output_tensor.shape[1]
    T_dec = T_out - 1
    H = params["enc_w_hh"].shape[1]
    V = params["proj_w"].shape[0]
    assert T_dec + 1 <= OUT_LANES

    B_pad = max(8, _round_up(B, 8))       # fill the 8 sublanes
    V_pad = max(128, _round_up(V, 128))   # fill the 128 lanes

    # pad the batch with dummy rows (token 0); results for them are discarded
    in_pad = jnp.zeros((B_pad, T_in), jnp.int32).at[:B, :].set(input_tensor)
    out_pad = jnp.zeros((B_pad, T_out), jnp.int32).at[:B, :].set(output_tensor)

    # per-token input-side gate tables (bias fused, g-gate columns x2 so the
    # kernel can use tanh(x) = 2*sigmoid(2x) - 1 with a single sigmoid pass)
    gscale = jnp.ones((1, 4 * H), jnp.float32).at[0, 2 * H:3 * H].set(2.0)
    enc_tab = (params["in_emb"] @ params["enc_w_ih"].T
               + params["enc_b_ih"] + params["enc_b_hh"]) * gscale
    dec_tab = (params["out_emb"] @ params["dec_w_ih"].T
               + params["dec_b_ih"] + params["dec_b_hh"]) * gscale

    # gather gate slabs directly in time-major layout: (T*B_pad, 4H) f32
    xg_all = enc_tab[in_pad.T.reshape(-1)]
    yg_all = dec_tab[out_pad[:, :T_dec].T.reshape(-1)]

    # teacher-forced target ids, time-major (T_dec*B_pad, 1) int32
    tgt_all = out_pad[:, 1:].T.reshape(-1, 1)

    # recurrent weights: transposed, g-columns x2, MXU dtype (bf16)
    whe = (params["enc_w_hh"].T * gscale).astype(MXU_DTYPE)
    whd = (params["dec_w_hh"].T * gscale).astype(MXU_DTYPE)

    # projection padded to 128 lanes: zero weights (bf16), very-negative bias
    # (kept in f32) so padded logits never win argmax / perturb logsumexp
    wp = jnp.zeros((H, V_pad), jnp.float32).at[:, :V].set(
        params["proj_w"].T).astype(MXU_DTYPE)
    bp = jnp.full((1, V_pad), -1e30, jnp.float32).at[0, :V].set(params["proj_b"])

    out = run_seq2seq(xg_all, yg_all, tgt_all, whe, whd, wp, bp,
                      B_pad, T_dec, H)
    toks = out[:B, :T_dec].astype(jnp.int32)
    clp = out[:B, T_dec]
    return toks, clp


# ----------------------------------------------------------------------------
# Pure-JAX reference (PyTorch math; dot_dtype lets us mirror bf16 MXU inputs)
# ----------------------------------------------------------------------------
def forward_reference(params, input_tensor, output_tensor, dot_dtype=jnp.float32):
    B = input_tensor.shape[0]
    H = params["enc_w_hh"].shape[1]
    f32 = jnp.float32
    h = jnp.zeros((B, H), f32)
    c = jnp.zeros((B, H), f32)

    def step(x, h, c, w_ih, w_hh, b_ih, b_hh):
        gates = (x @ w_ih.T + b_ih + b_hh
                 + jnp.dot(h.astype(dot_dtype), w_hh.T.astype(dot_dtype),
                           preferred_element_type=f32))
        i, f, g, o = jnp.split(gates, 4, axis=-1)
        c = jax.nn.sigmoid(f) * c + jax.nn.sigmoid(i) * jnp.tanh(g)
        h = jax.nn.sigmoid(o) * jnp.tanh(c)
        return h, c

    for t in range(input_tensor.shape[1]):
        x = params["in_emb"][input_tensor[:, t]]
        h, c = step(x, h, c, params["enc_w_ih"], params["enc_w_hh"],
                    params["enc_b_ih"], params["enc_b_hh"])

    wp_t = params["proj_w"].T.astype(dot_dtype)
    toks, lps, all_logits = [], [], []
    for t in range(output_tensor.shape[1] - 1):
        x = params["out_emb"][output_tensor[:, t]]
        h, c = step(x, h, c, params["dec_w_ih"], params["dec_w_hh"],
                    params["dec_b_ih"], params["dec_b_hh"])
        logits = jnp.dot(c.astype(dot_dtype), wp_t,
                         preferred_element_type=f32) + params["proj_b"]
        all_logits.append(logits)
        toks.append(jnp.argmax(logits, axis=-1).astype(jnp.int32))
        logp = jax.nn.log_softmax(logits, axis=-1)
        tgt_t = output_tensor[:, t + 1]
        lps.append(jnp.take_along_axis(logp, tgt_t[:, None], axis=1)[:, 0])
    return (jnp.stack(toks, axis=1),
            jnp.sum(jnp.stack(lps, axis=0), axis=0),
            jnp.stack(all_logits, axis=1))          # (B, T_dec, V)


# ----------------------------------------------------------------------------
if __name__ == "__main__":
    # module hyper-parameters (small, consistent with the forward pass)
    num_input_tokens = 12
    num_output_tokens = 16
    input_embedding_dim = 8
    output_embedding_dim = 8
    hidden_dim = 32
    input_start_token_index, input_end_token_index = 0, 1
    output_start_token_index, output_end_token_index = 0, 1

    key = jax.random.PRNGKey(0)
    pkey, ikey, okey = jax.random.split(key, 3)
    params = init_params(pkey, num_input_tokens, num_output_tokens,
                         input_embedding_dim, output_embedding_dim, hidden_dim)

    # ragged batches of token sequences (like List[torch.Tensor])
    batch_size = 4
    in_lens = [6, 4, 5, 3]
    out_lens = [7, 5, 6, 4]
    max_in, max_out = max(in_lens), max(out_lens)

    in_ids = jax.random.randint(ikey, (batch_size, max_in), 2, num_input_tokens, jnp.int32)
    out_ids = jax.random.randint(okey, (batch_size, max_out), 2, num_output_tokens, jnp.int32)

    # pad_sequence(batch_first=True, padding_value=end_token) equivalent.
    # NOTE: the PyTorch code pads the OUTPUT with input_end_token_index (quirk kept).
    pos_in = jnp.arange(max_in)[None, :]
    pos_out = jnp.arange(max_out)[None, :]
    in_lens_a = jnp.array(in_lens)[:, None]
    out_lens_a = jnp.array(out_lens)[:, None]
    input_tensor = jnp.where(pos_in < in_lens_a, in_ids, input_end_token_index).astype(jnp.int32)
    output_tensor = jnp.where(pos_out < out_lens_a, out_ids, input_end_token_index).astype(jnp.int32)
    # first decoder input token = start token
    output_tensor = output_tensor.at[:, 0].set(output_start_token_index)

    toks, cum_log_probs = forward_pallas(params, input_tensor, output_tensor)
    jax.block_until_ready((toks, cum_log_probs))

    assert toks.shape == (batch_size, max_out - 1)
    assert cum_log_probs.shape == (batch_size,)

    # reference mirroring the kernel's bf16 MXU operands (tight check)
    ref_toks, ref_clp, ref_logits = forward_reference(
        params, input_tensor, output_tensor, dot_dtype=MXU_DTYPE)
    assert bool(jnp.allclose(cum_log_probs, ref_clp, atol=2e-3, rtol=1e-3)), \
        "cum_log_probs mismatch vs bf16-mirrored reference"
    # compare greedy tokens where the reference's top-2 logit gap is non-degenerate
    top2 = jax.lax.top_k(ref_logits, 2)[0]
    confident = (top2[..., 0] - top2[..., 1]) > 1e-3
    assert bool(jnp.all(jnp.where(confident, toks == ref_toks, True))), \
        "greedy tokens mismatch vs bf16-mirrored reference"

    # loose sanity check against the pure-f32 (PyTorch-equivalent) reference
    _, f32_clp, _ = forward_reference(params, input_tensor, output_tensor,
                                      dot_dtype=jnp.float32)
    assert bool(jnp.allclose(cum_log_probs, f32_clp, atol=0.5, rtol=0.05)), \
        "cum_log_probs far from f32 reference"

    print("KERNEL_OK")
</pallas_src>

<mosaic_0001>
module attributes {stable_mosaic.version = 11 : i64} {
  func.func @seq2seq_kernel(%arg0: memref<48x128xf32, #tpu.memory_space<vmem>>, %arg1: memref<48x128xf32, #tpu.memory_space<vmem>>, %arg2: memref<48x1xi32, #tpu.memory_space<vmem>>, %arg3: memref<32x128xbf16, #tpu.memory_space<vmem>>, %arg4: memref<32x128xbf16, #tpu.memory_space<vmem>>, %arg5: memref<32x128xbf16, #tpu.memory_space<vmem>>, %arg6: memref<1x128xf32, #tpu.memory_space<vmem>>, %arg7: memref<8x128xf32, #tpu.memory_space<vmem>>, %arg8: memref<48x32xf32, #tpu.memory_space<vmem>>) attributes {dimension_semantics = [], scalar_prefetch = 0 : i64, scratch_operands = 1 : i64, tpu.core_type = #tpu.core_type<tc>} {
    %c0 = arith.constant 0 : index
    %c0_0 = arith.constant 0 : index
    %0 = vector.load %arg0[%c0, %c0_0] : memref<48x128xf32, #tpu.memory_space<vmem>>, vector<48x128xf32>
    %c0_1 = arith.constant 0 : index
    %c0_2 = arith.constant 0 : index
    %1 = vector.load %arg1[%c0_1, %c0_2] : memref<48x128xf32, #tpu.memory_space<vmem>>, vector<48x128xf32>
    %c0_3 = arith.constant 0 : index
    %c0_4 = arith.constant 0 : index
    %2 = vector.load %arg3[%c0_3, %c0_4] : memref<32x128xbf16, #tpu.memory_space<vmem>>, vector<32x128xbf16>
    %c0_5 = arith.constant 0 : index
    %c0_6 = arith.constant 0 : index
    %3 = vector.load %arg4[%c0_5, %c0_6] : memref<32x128xbf16, #tpu.memory_space<vmem>>, vector<32x128xbf16>
    %c0_7 = arith.constant 0 : index
    %c0_8 = arith.constant 0 : index
    %4 = vector.load %arg5[%c0_7, %c0_8] : memref<32x128xbf16, #tpu.memory_space<vmem>>, vector<32x128xbf16>
    %c0_9 = arith.constant 0 : index
    %c0_10 = arith.constant 0 : index
    %5 = vector.load %arg6[%c0_9, %c0_10] : memref<1x128xf32, #tpu.memory_space<vmem>>, vector<1x128xf32>
    %cst = arith.constant 0.000000e+00 : f32
    %6 = vector.broadcast %cst : f32 to vector<8x32xf32>
    %cst_11 = arith.constant 0.000000e+00 : f32
    %7 = vector.broadcast %cst_11 : f32 to vector<8x32xf32>
    %8 = vector.extract_strided_slice %0 {offsets = [0, 0], sizes = [8, 128], strides = [1, 1]} : vector<48x128xf32> to vector<8x128xf32>
    %9 = arith.truncf %6 : vector<8x32xf32> to vector<8x32xbf16>
    %cst_12 = arith.constant dense<0.000000e+00> : vector<8x128xf32>
    %10 = tpu.matmul %9, %2, %cst_12 {dimension_numbers = #tpu.dot_dimension_numbers<[1], [0], [0], [1], [0, 0, 1, 1], [], []>} : vector<8x32xbf16>, vector<32x128xbf16>, vector<8x128xf32> -> vector<8x128xf32>
    %11 = arith.addf %8, %10 : vector<8x128xf32>
    %12 = arith.negf %11 : vector<8x128xf32>
    %13 = math.exp %12 : vector<8x128xf32>
    %cst_13 = arith.constant 1.000000e+00 : f32
    %14 = vector.broadcast %cst_13 : f32 to vector<8x128xf32>
    %15 = arith.addf %14, %13 : vector<8x128xf32>
    %16 = arith.divf %14, %15 : vector<8x128xf32>
    %17 = vector.extract_strided_slice %16 {offsets = [0, 0], sizes = [8, 32], strides = [1, 1]} : vector<8x128xf32> to vector<8x32xf32>
    %18 = vector.extract_strided_slice %16 {offsets = [0, 32], sizes = [8, 32], strides = [1, 1]} : vector<8x128xf32> to vector<8x32xf32>
    %19 = vector.extract_strided_slice %16 {offsets = [0, 64], sizes = [8, 32], strides = [1, 1]} : vector<8x128xf32> to vector<8x32xf32>
    %cst_14 = arith.constant 2.000000e+00 : f32
    %20 = vector.broadcast %cst_14 : f32 to vector<8x32xf32>
    %21 = arith.mulf %20, %19 : vector<8x32xf32>
    %cst_15 = arith.constant 1.000000e+00 : f32
    %22 = vector.broadcast %cst_15 : f32 to vector<8x32xf32>
    %23 = arith.subf %21, %22 : vector<8x32xf32>
    %24 = vector.extract_strided_slice %16 {offsets = [0, 96], sizes = [8, 32], strides = [1, 1]} : vector<8x128xf32> to vector<8x32xf32>
    %25 = arith.mulf %18, %7 : vector<8x32xf32>
    %26 = arith.mulf %17, %23 : vector<8x32xf32>
    %27 = arith.addf %25, %26 : vector<8x32xf32>
    %28 = math.tanh %27 : vector<8x32xf32>
    %29 = arith.mulf %24, %28 : vector<8x32xf32>
    %30 = vector.extract_strided_slice %0 {offsets = [8, 0], sizes = [8, 128], strides = [1, 1]} : vector<48x128xf32> to vector<8x128xf32>
    %31 = arith.truncf %29 : vector<8x32xf32> to vector<8x32xbf16>
    %cst_16 = arith.constant dense<0.000000e+00> : vector<8x128xf32>
    %32 = tpu.matmul %31, %2, %cst_16 {dimension_numbers = #tpu.dot_dimension_numbers<[1], [0], [0], [1], [0, 0, 1, 1], [], []>} : vector<8x32xbf16>, vector<32x128xbf16>, vector<8x128xf32> -> vector<8x128xf32>
    %33 = arith.addf %30, %32 : vector<8x128xf32>
    %34 = arith.negf %33 : vector<8x128xf32>
    %35 = math.exp %34 : vector<8x128xf32>
    %cst_17 = arith.constant 1.000000e+00 : f32
    %36 = vector.broadcast %cst_17 : f32 to vector<8x128xf32>
    %37 = arith.addf %36, %35 : vector<8x128xf32>
    %38 = arith.divf %36, %37 : vector<8x128xf32>
    %39 = vector.extract_strided_slice %38 {offsets = [0, 0], sizes = [8, 32], strides = [1, 1]} : vector<8x128xf32> to vector<8x32xf32>
    %40 = vector.extract_strided_slice %38 {offsets = [0, 32], sizes = [8, 32], strides = [1, 1]} : vector<8x128xf32> to vector<8x32xf32>
    %41 = vector.extract_strided_slice %38 {offsets = [0, 64], sizes = [8, 32], strides = [1, 1]} : vector<8x128xf32> to vector<8x32xf32>
    %cst_18 = arith.constant 2.000000e+00 : f32
    %42 = vector.broadcast %cst_18 : f32 to vector<8x32xf32>
    %43 = arith.mulf %42, %41 : vector<8x32xf32>
    %cst_19 = arith.constant 1.000000e+00 : f32
    %44 = vector.broadcast %cst_19 : f32 to vector<8x32xf32>
    %45 = arith.subf %43, %44 : vector<8x32xf32>
    %46 = vector.extract_strided_slice %38 {offsets = [0, 96], sizes = [8, 32], strides = [1, 1]} : vector<8x128xf32> to vector<8x32xf32>
    %47 = arith.mulf %40, %27 : vector<8x32xf32>
    %48 = arith.mulf %39, %45 : vector<8x32xf32>
    %49 = arith.addf %47, %48 : vector<8x32xf32>
    %50 = math.tanh %49 : vector<8x32xf32>
    %51 = arith.mulf %46, %50 : vector<8x32xf32>
    %52 = vector.extract_strided_slice %0 {offsets = [16, 0], sizes = [8, 128], strides = [1, 1]} : vector<48x128xf32> to vector<8x128xf32>
    %53 = arith.truncf %51 : vector<8x32xf32> to vector<8x32xbf16>
    %cst_20 = arith.constant dense<0.000000e+00> : vector<8x128xf32>
    %54 = tpu.matmul %53, %2, %cst_20 {dimension_numbers = #tpu.dot_dimension_numbers<[1], [0], [0], [1], [0, 0, 1, 1], [], []>} : vector<8x32xbf16>, vector<32x128xbf16>, vector<8x128xf32> -> vector<8x128xf32>
    %55 = arith.addf %52, %54 : vector<8x128xf32>
    %56 = arith.negf %55 : vector<8x128xf32>
    %57 = math.exp %56 : vector<8x128xf32>
    %cst_21 = arith.constant 1.000000e+00 : f32
    %58 = vector.broadcast %cst_21 : f32 to vector<8x128xf32>
    %59 = arith.addf %58, %57 : vector<8x128xf32>
    %60 = arith.divf %58, %59 : vector<8x128xf32>
    %61 = vector.extract_strided_slice %60 {offsets = [0, 0], sizes = [8, 32], strides = [1, 1]} : vector<8x128xf32> to vector<8x32xf32>
    %62 = vector.extract_strided_slice %60 {offsets = [0, 32], sizes = [8, 32], strides = [1, 1]} : vector<8x128xf32> to vector<8x32xf32>
    %63 = vector.extract_strided_slice %60 {offsets = [0, 64], sizes = [8, 32], strides = [1, 1]} : vector<8x128xf32> to vector<8x32xf32>
    %cst_22 = arith.constant 2.000000e+00 : f32
    %64 = vector.broadcast %cst_22 : f32 to vector<8x32xf32>
    %65 = arith.mulf %64, %63 : vector<8x32xf32>
    %cst_23 = arith.constant 1.000000e+00 : f32
    %66 = vector.broadcast %cst_23 : f32 to vector<8x32xf32>
    %67 = arith.subf %65, %66 : vector<8x32xf32>
    %68 = vector.extract_strided_slice %60 {offsets = [0, 96], sizes = [8, 32], strides = [1, 1]} : vector<8x128xf32> to vector<8x32xf32>
    %69 = arith.mulf %62, %49 : vector<8x32xf32>
    %70 = arith.mulf %61, %67 : vector<8x32xf32>
    %71 = arith.addf %69, %70 : vector<8x32xf32>
    %72 = math.tanh %71 : vector<8x32xf32>
    %73 = arith.mulf %68, %72 : vector<8x32xf32>
    %74 = vector.extract_strided_slice %0 {offsets = [24, 0], sizes = [8, 128], strides = [1, 1]} : vector<48x128xf32> to vector<8x128xf32>
    %75 = arith.truncf %73 : vector<8x32xf32> to vector<8x32xbf16>
    %cst_24 = arith.constant dense<0.000000e+00> : vector<8x128xf32>
    %76 = tpu.matmul %75, %2, %cst_24 {dimension_numbers = #tpu.dot_dimension_numbers<[1], [0], [0], [1], [0, 0, 1, 1], [], []>} : vector<8x32xbf16>, vector<32x128xbf16>, vector<8x128xf32> -> vector<8x128xf32>
    %77 = arith.addf %74, %76 : vector<8x128xf32>
    %78 = arith.negf %77 : vector<8x128xf32>
    %79 = math.exp %78 : vector<8x128xf32>
    %cst_25 = arith.constant 1.000000e+00 : f32
    %80 = vector.broadcast %cst_25 : f32 to vector<8x128xf32>
    %81 = arith.addf %80, %79 : vector<8x128xf32>
    %82 = arith.divf %80, %81 : vector<8x128xf32>
    %83 = vector.extract_strided_slice %82 {offsets = [0, 0], sizes = [8, 32], strides = [1, 1]} : vector<8x128xf32> to vector<8x32xf32>
    %84 = vector.extract_strided_slice %82 {offsets = [0, 32], sizes = [8, 32], strides = [1, 1]} : vector<8x128xf32> to vector<8x32xf32>
    %85 = vector.extract_strided_slice %82 {offsets = [0, 64], sizes = [8, 32], strides = [1, 1]} : vector<8x128xf32> to vector<8x32xf32>
    %cst_26 = arith.constant 2.000000e+00 : f32
    %86 = vector.broadcast %cst_26 : f32 to vector<8x32xf32>
    %87 = arith.mulf %86, %85 : vector<8x32xf32>
    %cst_27 = arith.constant 1.000000e+00 : f32
    %88 = vector.broadcast %cst_27 : f32 to vector<8x32xf32>
    %89 = arith.subf %87, %88 : vector<8x32xf32>
    %90 = vector.extract_strided_slice %82 {offsets = [0, 96], sizes = [8, 32], strides = [1, 1]} : vector<8x128xf32> to vector<8x32xf32>
    %91 = arith.mulf %84, %71 : vector<8x32xf32>
    %92 = arith.mulf %83, %89 : vector<8x32xf32>
    %93 = arith.addf %91, %92 : vector<8x32xf32>
    %94 = math.tanh %93 : vector<8x32xf32>
    %95 = arith.mulf %90, %94 : vector<8x32xf32>
    %96 = vector.extract_strided_slice %0 {offsets = [32, 0], sizes = [8, 128], strides = [1, 1]} : vector<48x128xf32> to vector<8x128xf32>
    %97 = arith.truncf %95 : vector<8x32xf32> to vector<8x32xbf16>
    %cst_28 = arith.constant dense<0.000000e+00> : vector<8x128xf32>
    %98 = tpu.matmul %97, %2, %cst_28 {dimension_numbers = #tpu.dot_dimension_numbers<[1], [0], [0], [1], [0, 0, 1, 1], [], []>} : vector<8x32xbf16>, vector<32x128xbf16>, vector<8x128xf32> -> vector<8x128xf32>
    %99 = arith.addf %96, %98 : vector<8x128xf32>
    %100 = arith.negf %99 : vector<8x128xf32>
    %101 = math.exp %100 : vector<8x128xf32>
    %cst_29 = arith.constant 1.000000e+00 : f32
    %102 = vector.broadcast %cst_29 : f32 to vector<8x128xf32>
    %103 = arith.addf %102, %101 : vector<8x128xf32>
    %104 = arith.divf %102, %103 : vector<8x128xf32>
    %105 = vector.extract_strided_slice %104 {offsets = [0, 0], sizes = [8, 32], strides = [1, 1]} : vector<8x128xf32> to vector<8x32xf32>
    %106 = vector.extract_strided_slice %104 {offsets = [0, 32], sizes = [8, 32], strides = [1, 1]} : vector<8x128xf32> to vector<8x32xf32>
    %107 = vector.extract_strided_slice %104 {offsets = [0, 64], sizes = [8, 32], strides = [1, 1]} : vector<8x128xf32> to vector<8x32xf32>
    %cst_30 = arith.constant 2.000000e+00 : f32
    %108 = vector.broadcast %cst_30 : f32 to vector<8x32xf32>
    %109 = arith.mulf %108, %107 : vector<8x32xf32>
    %cst_31 = arith.constant 1.000000e+00 : f32
    %110 = vector.broadcast %cst_31 : f32 to vector<8x32xf32>
    %111 = arith.subf %109, %110 : vector<8x32xf32>
    %112 = vector.extract_strided_slice %104 {offsets = [0, 96], sizes = [8, 32], strides = [1, 1]} : vector<8x128xf32> to vector<8x32xf32>
    %113 = arith.mulf %106, %93 : vector<8x32xf32>
    %114 = arith.mulf %105, %111 : vector<8x32xf32>
    %115 = arith.addf %113, %114 : vector<8x32xf32>
    %116 = math.tanh %115 : vector<8x32xf32>
    %117 = arith.mulf %112, %116 : vector<8x32xf32>
    %118 = vector.extract_strided_slice %0 {offsets = [40, 0], sizes = [8, 128], strides = [1, 1]} : vector<48x128xf32> to vector<8x128xf32>
    %119 = arith.truncf %117 : vector<8x32xf32> to vector<8x32xbf16>
    %cst_32 = arith.constant dense<0.000000e+00> : vector<8x128xf32>
    %120 = tpu.matmul %119, %2, %cst_32 {dimension_numbers = #tpu.dot_dimension_numbers<[1], [0], [0], [1], [0, 0, 1, 1], [], []>} : vector<8x32xbf16>, vector<32x128xbf16>, vector<8x128xf32> -> vector<8x128xf32>
    %121 = arith.addf %118, %120 : vector<8x128xf32>
    %122 = arith.negf %121 : vector<8x128xf32>
    %123 = math.exp %122 : vector<8x128xf32>
    %cst_33 = arith.constant 1.000000e+00 : f32
    %124 = vector.broadcast %cst_33 : f32 to vector<8x128xf32>
    %125 = arith.addf %124, %123 : vector<8x128xf32>
    %126 = arith.divf %124, %125 : vector<8x128xf32>
    %127 = vector.extract_strided_slice %126 {offsets = [0, 0], sizes = [8, 32], strides = [1, 1]} : vector<8x128xf32> to vector<8x32xf32>
    %128 = vector.extract_strided_slice %126 {offsets = [0, 32], sizes = [8, 32], strides = [1, 1]} : vector<8x128xf32> to vector<8x32xf32>
    %129 = vector.extract_strided_slice %126 {offsets = [0, 64], sizes = [8, 32], strides = [1, 1]} : vector<8x128xf32> to vector<8x32xf32>
    %cst_34 = arith.constant 2.000000e+00 : f32
    %130 = vector.broadcast %cst_34 : f32 to vector<8x32xf32>
    %131 = arith.mulf %130, %129 : vector<8x32xf32>
    %cst_35 = arith.constant 1.000000e+00 : f32
    %132 = vector.broadcast %cst_35 : f32 to vector<8x32xf32>
    %133 = arith.subf %131, %132 : vector<8x32xf32>
    %134 = vector.extract_strided_slice %126 {offsets = [0, 96], sizes = [8, 32], strides = [1, 1]} : vector<8x128xf32> to vector<8x32xf32>
    %135 = arith.mulf %128, %115 : vector<8x32xf32>
    %136 = arith.mulf %127, %133 : vector<8x32xf32>
    %137 = arith.addf %135, %136 : vector<8x32xf32>
    %138 = math.tanh %137 : vector<8x32xf32>
    %139 = arith.mulf %134, %138 : vector<8x32xf32>
    %140 = vector.extract_strided_slice %1 {offsets = [0, 0], sizes = [8, 128], strides = [1, 1]} : vector<48x128xf32> to vector<8x128xf32>
    %141 = arith.truncf %139 : vector<8x32xf32> to vector<8x32xbf16>
    %cst_36 = arith.constant dense<0.000000e+00> : vector<8x128xf32>
    %142 = tpu.matmul %141, %3, %cst_36 {dimension_numbers = #tpu.dot_dimension_numbers<[1], [0], [0], [1], [0, 0, 1, 1], [], []>} : vector<8x32xbf16>, vector<32x128xbf16>, vector<8x128xf32> -> vector<8x128xf32>
    %143 = arith.addf %140, %142 : vector<8x128xf32>
    %144 = arith.negf %143 : vector<8x128xf32>
    %145 = math.exp %144 : vector<8x128xf32>
    %cst_37 = arith.constant 1.000000e+00 : f32
    %146 = vector.broadcast %cst_37 : f32 to vector<8x128xf32>
    %147 = arith.addf %146, %145 : vector<8x128xf32>
    %148 = arith.divf %146, %147 : vector<8x128xf32>
    %149 = vector.extract_strided_slice %148 {offsets = [0, 0], sizes = [8, 32], strides = [1, 1]} : vector<8x128xf32> to vector<8x32xf32>
    %150 = vector.extract_strided_slice %148 {offsets = [0, 32], sizes = [8, 32], strides = [1, 1]} : vector<8x128xf32> to vector<8x32xf32>
    %151 = vector.extract_strided_slice %148 {offsets = [0, 64], sizes = [8, 32], strides = [1, 1]} : vector<8x128xf32> to vector<8x32xf32>
    %cst_38 = arith.constant 2.000000e+00 : f32
    %152 = vector.broadcast %cst_38 : f32 to vector<8x32xf32>
    %153 = arith.mulf %152, %151 : vector<8x32xf32>
    %cst_39 = arith.constant 1.000000e+00 : f32
    %154 = vector.broadcast %cst_39 : f32 to vector<8x32xf32>
    %155 = arith.subf %153, %154 : vector<8x32xf32>
    %156 = vector.extract_strided_slice %148 {offsets = [0, 96], sizes = [8, 32], strides = [1, 1]} : vector<8x128xf32> to vector<8x32xf32>
    %157 = arith.mulf %150, %137 : vector<8x32xf32>
    %158 = arith.mulf %149, %155 : vector<8x32xf32>
    %159 = arith.addf %157, %158 : vector<8x32xf32>
    %160 = math.tanh %159 : vector<8x32xf32>
    %161 = arith.mulf %156, %160 : vector<8x32xf32>
    %c0_40 = arith.constant 0 : index
    %c0_41 = arith.constant 0 : index
    %162 = vector.load %arg8[%c0_40, %c0_41] : memref<48x32xf32, #tpu.memory_space<vmem>>, vector<8x32xf32>
    tpu.vector_store %arg8[%c0_40, %c0_41], %159 {strides = array<i32>} : memref<48x32xf32, #tpu.memory_space<vmem>>, vector<8x32xf32>,
    %163 = vector.extract_strided_slice %1 {offsets = [8, 0], sizes = [8, 128], strides = [1, 1]} : vector<48x128xf32> to vector<8x128xf32>
    %164 = arith.truncf %161 : vector<8x32xf32> to vector<8x32xbf16>
    %cst_42 = arith.constant dense<0.000000e+00> : vector<8x128xf32>
    %165 = tpu.matmul %164, %3, %cst_42 {dimension_numbers = #tpu.dot_dimension_numbers<[1], [0], [0], [1], [0, 0, 1, 1], [], []>} : vector<8x32xbf16>, vector<32x128xbf16>, vector<8x128xf32> -> vector<8x128xf32>
    %166 = arith.addf %163, %165 : vector<8x128xf32>
    %167 = arith.negf %166 : vector<8x128xf32>
    %168 = math.exp %167 : vector<8x128xf32>
    %cst_43 = arith.constant 1.000000e+00 : f32
    %169 = vector.broadcast %cst_43 : f32 to vector<8x128xf32>
    %170 = arith.addf %169, %168 : vector<8x128xf32>
    %171 = arith.divf %169, %170 : vector<8x128xf32>
    %172 = vector.extract_strided_slice %171 {offsets = [0, 0], sizes = [8, 32], strides = [1, 1]} : vector<8x128xf32> to vector<8x32xf32>
    %173 = vector.extract_strided_slice %171 {offsets = [0, 32], sizes = [8, 32], strides = [1, 1]} : vector<8x128xf32> to vector<8x32xf32>
    %174 = vector.extract_strided_slice %171 {offsets = [0, 64], sizes = [8, 32], strides = [1, 1]} : vector<8x128xf32> to vector<8x32xf32>
    %cst_44 = arith.constant 2.000000e+00 : f32
    %175 = vector.broadcast %cst_44 : f32 to vector<8x32xf32>
    %176 = arith.mulf %175, %174 : vector<8x32xf32>
    %cst_45 = arith.constant 1.000000e+00 : f32
    %177 = vector.broadcast %cst_45 : f32 to vector<8x32xf32>
    %178 = arith.subf %176, %177 : vector<8x32xf32>
    %179 = vector.extract_strided_slice %171 {offsets = [0, 96], sizes = [8, 32], strides = [1, 1]} : vector<8x128xf32> to vector<8x32xf32>
    %180 = arith.mulf %173, %159 : vector<8x32xf32>
    %181 = arith.mulf %172, %178 : vector<8x32xf32>
    %182 = arith.addf %180, %181 : vector<8x32xf32>
    %183 = math.tanh %182 : vector<8x32xf32>
    %184 = arith.mulf %179, %183 : vector<8x32xf32>
    %c8 = arith.constant 8 : index
    %c0_46 = arith.constant 0 : index
    %185 = vector.load %arg8[%c8, %c0_46] : memref<48x32xf32, #tpu.memory_space<vmem>>, vector<8x32xf32>
    tpu.vector_store %arg8[%c8, %c0_46], %182 {strides = array<i32>} : memref<48x32xf32, #tpu.memory_space<vmem>>, vector<8x32xf32>,
    %186 = vector.extract_strided_slice %1 {offsets = [16, 0], sizes = [8, 128], strides = [1, 1]} : vector<48x128xf32> to vector<8x128xf32>
    %187 = arith.truncf %184 : vector<8x32xf32> to vector<8x32xbf16>
    %cst_47 = arith.constant dense<0.000000e+00> : vector<8x128xf32>
    %188 = tpu.matmul %187, %3, %cst_47 {dimension_numbers = #tpu.dot_dimension_numbers<[1], [0], [0], [1], [0, 0, 1, 1], [], []>} : vector<8x32xbf16>, vector<32x128xbf16>, vector<8x128xf32> -> vector<8x128xf32>
    %189 = arith.addf %186, %188 : vector<8x128xf32>
    %190 = arith.negf %189 : vector<8x128xf32>
    %191 = math.exp %190 : vector<8x128xf32>
    %cst_48 = arith.constant 1.000000e+00 : f32
    %192 = vector.broadcast %cst_48 : f32 to vector<8x128xf32>
    %193 = arith.addf %192, %191 : vector<8x128xf32>
    %194 = arith.divf %192, %193 : vector<8x128xf32>
    %195 = vector.extract_strided_slice %194 {offsets = [0, 0], sizes = [8, 32], strides = [1, 1]} : vector<8x128xf32> to vector<8x32xf32>
    %196 = vector.extract_strided_slice %194 {offsets = [0, 32], sizes = [8, 32], strides = [1, 1]} : vector<8x128xf32> to vector<8x32xf32>
    %197 = vector.extract_strided_slice %194 {offsets = [0, 64], sizes = [8, 32], strides = [1, 1]} : vector<8x128xf32> to vector<8x32xf32>
    %cst_49 = arith.constant 2.000000e+00 : f32
    %198 = vector.broadcast %cst_49 : f32 to vector<8x32xf32>
    %199 = arith.mulf %198, %197 : vector<8x32xf32>
    %cst_50 = arith.constant 1.000000e+00 : f32
    %200 = vector.broadcast %cst_50 : f32 to vector<8x32xf32>
    %201 = arith.subf %199, %200 : vector<8x32xf32>
    %202 = vector.extract_strided_slice %194 {offsets = [0, 96], sizes = [8, 32], strides = [1, 1]} : vector<8x128xf32> to vector<8x32xf32>
    %203 = arith.mulf %196, %182 : vector<8x32xf32>
    %204 = arith.mulf %195, %201 : vector<8x32xf32>
    %205 = arith.addf %203, %204 : vector<8x32xf32>
    %206 = math.tanh %205 : vector<8x32xf32>
    %207 = arith.mulf %202, %206 : vector<8x32xf32>
    %c16 = arith.constant 16 : index
    %c0_51 = arith.constant 0 : index
    %208 = vector.load %arg8[%c16, %c0_51] : memref<48x32xf32, #tpu.memory_space<vmem>>, vector<8x32xf32>
    tpu.vector_store %arg8[%c16, %c0_51], %205 {strides = array<i32>} : memref<48x32xf32, #tpu.memory_space<vmem>>, vector<8x32xf32>,
    %209 = vector.extract_strided_slice %1 {offsets = [24, 0], sizes = [8, 128], strides = [1, 1]} : vector<48x128xf32> to vector<8x128xf32>
    %210 = arith.truncf %207 : vector<8x32xf32> to vector<8x32xbf16>
    %cst_52 = arith.constant dense<0.000000e+00> : vector<8x128xf32>
    %211 = tpu.matmul %210, %3, %cst_52 {dimension_numbers = #tpu.dot_dimension_numbers<[1], [0], [0], [1], [0, 0, 1, 1], [], []>} : vector<8x32xbf16>, vector<32x128xbf16>, vector<8x128xf32> -> vector<8x128xf32>
    %212 = arith.addf %209, %211 : vector<8x128xf32>
    %213 = arith.negf %212 : vector<8x128xf32>
    %214 = math.exp %213 : vector<8x128xf32>
    %cst_53 = arith.constant 1.000000e+00 : f32
    %215 = vector.broadcast %cst_53 : f32 to vector<8x128xf32>
    %216 = arith.addf %215, %214 : vector<8x128xf32>
    %217 = arith.divf %215, %216 : vector<8x128xf32>
    %218 = vector.extract_strided_slice %217 {offsets = [0, 0], sizes = [8, 32], strides = [1, 1]} : vector<8x128xf32> to vector<8x32xf32>
    %219 = vector.extract_strided_slice %217 {offsets = [0, 32], sizes = [8, 32], strides = [1, 1]} : vector<8x128xf32> to vector<8x32xf32>
    %220 = vector.extract_strided_slice %217 {offsets = [0, 64], sizes = [8, 32], strides = [1, 1]} : vector<8x128xf32> to vector<8x32xf32>
    %cst_54 = arith.constant 2.000000e+00 : f32
    %221 = vector.broadcast %cst_54 : f32 to vector<8x32xf32>
    %222 = arith.mulf %221, %220 : vector<8x32xf32>
    %cst_55 = arith.constant 1.000000e+00 : f32
    %223 = vector.broadcast %cst_55 : f32 to vector<8x32xf32>
    %224 = arith.subf %222, %223 : vector<8x32xf32>
    %225 = vector.extract_strided_slice %217 {offsets = [0, 96], sizes = [8, 32], strides = [1, 1]} : vector<8x128xf32> to vector<8x32xf32>
    %226 = arith.mulf %219, %205 : vector<8x32xf32>
    %227 = arith.mulf %218, %224 : vector<8x32xf32>
    %228 = arith.addf %226, %227 : vector<8x32xf32>
    %229 = math.tanh %228 : vector<8x32xf32>
    %230 = arith.mulf %225, %229 : vector<8x32xf32>
    %c24 = arith.constant 24 : index
    %c0_56 = arith.constant 0 : index
    %231 = vector.load %arg8[%c24, %c0_56] : memref<48x32xf32, #tpu.memory_space<vmem>>, vector<8x32xf32>
    tpu.vector_store %arg8[%c24, %c0_56], %228 {strides = array<i32>} : memref<48x32xf32, #tpu.memory_space<vmem>>, vector<8x32xf32>,
    %232 = vector.extract_strided_slice %1 {offsets = [32, 0], sizes = [8, 128], strides = [1, 1]} : vector<48x128xf32> to vector<8x128xf32>
    %233 = arith.truncf %230 : vector<8x32xf32> to vector<8x32xbf16>
    %cst_57 = arith.constant dense<0.000000e+00> : vector<8x128xf32>
    %234 = tpu.matmul %233, %3, %cst_57 {dimension_numbers = #tpu.dot_dimension_numbers<[1], [0], [0], [1], [0, 0, 1, 1], [], []>} : vector<8x32xbf16>, vector<32x128xbf16>, vector<8x128xf32> -> vector<8x128xf32>
    %235 = arith.addf %232, %234 : vector<8x128xf32>
    %236 = arith.negf %235 : vector<8x128xf32>
    %237 = math.exp %236 : vector<8x128xf32>
    %cst_58 = arith.constant 1.000000e+00 : f32
    %238 = vector.broadcast %cst_58 : f32 to vector<8x128xf32>
    %239 = arith.addf %238, %237 : vector<8x128xf32>
    %240 = arith.divf %238, %239 : vector<8x128xf32>
    %241 = vector.extract_strided_slice %240 {offsets = [0, 0], sizes = [8, 32], strides = [1, 1]} : vector<8x128xf32> to vector<8x32xf32>
    %242 = vector.extract_strided_slice %240 {offsets = [0, 32], sizes = [8, 32], strides = [1, 1]} : vector<8x128xf32> to vector<8x32xf32>
    %243 = vector.extract_strided_slice %240 {offsets = [0, 64], sizes = [8, 32], strides = [1, 1]} : vector<8x128xf32> to vector<8x32xf32>
    %cst_59 = arith.constant 2.000000e+00 : f32
    %244 = vector.broadcast %cst_59 : f32 to vector<8x32xf32>
    %245 = arith.mulf %244, %243 : vector<8x32xf32>
    %cst_60 = arith.constant 1.000000e+00 : f32
    %246 = vector.broadcast %cst_60 : f32 to vector<8x32xf32>
    %247 = arith.subf %245, %246 : vector<8x32xf32>
    %248 = vector.extract_strided_slice %240 {offsets = [0, 96], sizes = [8, 32], strides = [1, 1]} : vector<8x128xf32> to vector<8x32xf32>
    %249 = arith.mulf %242, %228 : vector<8x32xf32>
    %250 = arith.mulf %241, %247 : vector<8x32xf32>
    %251 = arith.addf %249, %250 : vector<8x32xf32>
    %252 = math.tanh %251 : vector<8x32xf32>
    %253 = arith.mulf %248, %252 : vector<8x32xf32>
    %c32 = arith.constant 32 : index
    %c0_61 = arith.constant 0 : index
    %254 = vector.load %arg8[%c32, %c0_61] : memref<48x32xf32, #tpu.memory_space<vmem>>, vector<8x32xf32>
    tpu.vector_store %arg8[%c32, %c0_61], %251 {strides = array<i32>} : memref<48x32xf32, #tpu.memory_space<vmem>>, vector<8x32xf32>,
    %255 = vector.extract_strided_slice %1 {offsets = [40, 0], sizes = [8, 128], strides = [1, 1]} : vector<48x128xf32> to vector<8x128xf32>
    %256 = arith.truncf %253 : vector<8x32xf32> to vector<8x32xbf16>
    %cst_62 = arith.constant dense<0.000000e+00> : vector<8x128xf32>
    %257 = tpu.matmul %256, %3, %cst_62 {dimension_numbers = #tpu.dot_dimension_numbers<[1], [0], [0], [1], [0, 0, 1, 1], [], []>} : vector<8x32xbf16>, vector<32x128xbf16>, vector<8x128xf32> -> vector<8x128xf32>
    %258 = arith.addf %255, %257 : vector<8x128xf32>
    %259 = arith.negf %258 : vector<8x128xf32>
    %260 = math.exp %259 : vector<8x128xf32>
    %cst_63 = arith.constant 1.000000e+00 : f32
    %261 = vector.broadcast %cst_63 : f32 to vector<8x128xf32>
    %262 = arith.addf %261, %260 : vector<8x128xf32>
    %263 = arith.divf %261, %262 : vector<8x128xf32>
    %264 = vector.extract_strided_slice %263 {offsets = [0, 0], sizes = [8, 32], strides = [1, 1]} : vector<8x128xf32> to vector<8x32xf32>
    %265 = vector.extract_strided_slice %263 {offsets = [0, 32], sizes = [8, 32], strides = [1, 1]} : vector<8x128xf32> to vector<8x32xf32>
    %266 = vector.extract_strided_slice %263 {offsets = [0, 64], sizes = [8, 32], strides = [1, 1]} : vector<8x128xf32> to vector<8x32xf32>
    %cst_64 = arith.constant 2.000000e+00 : f32
    %267 = vector.broadcast %cst_64 : f32 to vector<8x32xf32>
    %268 = arith.mulf %267, %266 : vector<8x32xf32>
    %cst_65 = arith.constant 1.000000e+00 : f32
    %269 = vector.broadcast %cst_65 : f32 to vector<8x32xf32>
    %270 = arith.subf %268, %269 : vector<8x32xf32>
    %271 = arith.mulf %265, %251 : vector<8x32xf32>
    %272 = arith.mulf %264, %270 : vector<8x32xf32>
    %273 = arith.addf %271, %272 : vector<8x32xf32>
    %c40 = arith.constant 40 : index
    %c0_66 = arith.constant 0 : index
    %274 = vector.load %arg8[%c40, %c0_66] : memref<48x32xf32, #tpu.memory_space<vmem>>, vector<8x32xf32>
    tpu.vector_store %arg8[%c40, %c0_66], %273 {strides = array<i32>} : memref<48x32xf32, #tpu.memory_space<vmem>>, vector<8x32xf32>,
    %c0_67 = arith.constant 0 : index
    %c0_68 = arith.constant 0 : index
    %275 = vector.load %arg8[%c0_67, %c0_68] : memref<48x32xf32, #tpu.memory_space<vmem>>, vector<48x32xf32>
    %276 = arith.truncf %275 : vector<48x32xf32> to vector<48x32xbf16>
    %cst_69 = arith.constant dense<0.000000e+00> : vector<48x128xf32>
    %277 = tpu.matmul %276, %4, %cst_69 {dimension_numbers = #tpu.dot_dimension_numbers<[1], [0], [0], [1], [0, 0, 1, 1], [], []>} : vector<48x32xbf16>, vector<32x128xbf16>, vector<48x128xf32> -> vector<48x128xf32>
    %278 = vector.broadcast %5 : vector<1x128xf32> to vector<48x128xf32>
    %279 = arith.addf %277, %278 : vector<48x128xf32>
    %280 = tpu.iota {dimensions = array<i32: 1>} : vector<48x128xi32>
    %cst_70 = arith.constant dense<0xFF800000> : vector<48xf32>
    %281 = vector.multi_reduction <maximumf>, %279, %cst_70 [1] : vector<48x128xf32> to vector<48xf32>
    %282 = vector.shape_cast %281 : vector<48xf32> to vector<48x1xf32>
    %283 = vector.broadcast %282 : vector<48x1xf32> to vector<48x128xf32>
    %284 = arith.cmpf oeq, %279, %283 : vector<48x128xf32>
    %c128_i32 = arith.constant 128 : i32
    %285 = vector.broadcast %c128_i32 : i32 to vector<48x128xi32>
    %286 = arith.select %284, %280, %285 : vector<48x128xi1>, vector<48x128xi32>
    %cst_71 = arith.constant dense<2147483647> : vector<48xi32>
    %287 = vector.multi_reduction <minsi>, %286, %cst_71 [1] : vector<48x128xi32> to vector<48xi32>
    %288 = vector.shape_cast %287 : vector<48xi32> to vector<48x1xi32>
    %289 = vector.broadcast %282 : vector<48x1xf32> to vector<48x128xf32>
    %290 = arith.subf %279, %289 : vector<48x128xf32>
    %291 = math.exp %290 : vector<48x128xf32>
    %cst_72 = arith.constant dense<0.000000e+00> : vector<48xf32>
    %292 = vector.multi_reduction <add>, %291, %cst_72 [1] : vector<48x128xf32> to vector<48xf32>
    %293 = vector.shape_cast %292 : vector<48xf32> to vector<48x1xf32>
    %294 = math.log %293 : vector<48x1xf32>
    %295 = arith.addf %282, %294 : vector<48x1xf32>
    %c0_73 = arith.constant 0 : index
    %c0_74 = arith.constant 0 : index
    %296 = vector.load %arg2[%c0_73, %c0_74] : memref<48x1xi32, #tpu.memory_space<vmem>>, vector<48x1xi32>
    %297 = vector.broadcast %296 : vector<48x1xi32> to vector<48x128xi32>
    %298 = arith.cmpi eq, %280, %297 : vector<48x128xi32>
    %cst_75 = arith.constant 0.000000e+00 : f32
    %299 = vector.broadcast %cst_75 : f32 to vector<48x128xf32>
    %300 = arith.select %298, %279, %299 : vector<48x128xi1>, vector<48x128xf32>
    %cst_76 = arith.constant dense<0.000000e+00> : vector<48xf32>
    %301 = vector.multi_reduction <add>, %300, %cst_76 [1] : vector<48x128xf32> to vector<48xf32>
    %302 = vector.shape_cast %301 : vector<48xf32> to vector<48x1xf32>
    %303 = arith.subf %302, %295 : vector<48x1xf32>
    %304 = tpu.iota {dimensions = array<i32: 1>} : vector<8x128xi32>
    %cst_77 = arith.constant 0.000000e+00 : f32
    %305 = vector.broadcast %cst_77 : f32 to vector<8x128xf32>
    %cst_78 = arith.constant 0.000000e+00 : f32
    %306 = vector.broadcast %cst_78 : f32 to vector<8x1xf32>
    %307 = arith.sitofp %288 : vector<48x1xi32> to vector<48x1xf32>
    %c0_i32 = arith.constant 0 : i32
    %308 = vector.broadcast %c0_i32 : i32 to vector<8x128xi32>
    %309 = arith.cmpi eq, %304, %308 : vector<8x128xi32>
    %310 = vector.extract_strided_slice %307 {offsets = [0, 0], sizes = [8, 1], strides = [1, 1]} : vector<48x1xf32> to vector<8x1xf32>
    %311 = vector.shape_cast %310 : vector<8x1xf32> to vector<8x1xf32>
    %312 = vector.broadcast %311 : vector<8x1xf32> to vector<8x128xf32>
    %313 = arith.select %309, %312, %305 : vector<8x128xi1>, vector<8x128xf32>
    %314 = vector.extract_strided_slice %303 {offsets = [0, 0], sizes = [8, 1], strides = [1, 1]} : vector<48x1xf32> to vector<8x1xf32>
    %315 = arith.addf %306, %314 : vector<8x1xf32>
    %c1_i32 = arith.constant 1 : i32
    %316 = vector.broadcast %c1_i32 : i32 to vector<8x128xi32>
    %317 = arith.cmpi eq, %304, %316 : vector<8x128xi32>
    %318 = vector.extract_strided_slice %307 {offsets = [8, 0], sizes = [8, 1], strides = [1, 1]} : vector<48x1xf32> to vector<8x1xf32>
    %319 = vector.shape_cast %318 : vector<8x1xf32> to vector<8x1xf32>
    %320 = vector.broadcast %319 : vector<8x1xf32> to vector<8x128xf32>
    %321 = arith.select %317, %320, %313 : vector<8x128xi1>, vector<8x128xf32>
    %322 = vector.extract_strided_slice %303 {offsets = [8, 0], sizes = [8, 1], strides = [1, 1]} : vector<48x1xf32> to vector<8x1xf32>
    %323 = arith.addf %315, %322 : vector<8x1xf32>
    %c2_i32 = arith.constant 2 : i32
    %324 = vector.broadcast %c2_i32 : i32 to vector<8x128xi32>
    %325 = arith.cmpi eq, %304, %324 : vector<8x128xi32>
    %326 = vector.extract_strided_slice %307 {offsets = [16, 0], sizes = [8, 1], strides = [1, 1]} : vector<48x1xf32> to vector<8x1xf32>
    %327 = vector.shape_cast %326 : vector<8x1xf32> to vector<8x1xf32>
    %328 = vector.broadcast %327 : vector<8x1xf32> to vector<8x128xf32>
    %329 = arith.select %325, %328, %321 : vector<8x128xi1>, vector<8x128xf32>
    %330 = vector.extract_strided_slice %303 {offsets = [16, 0], sizes = [8, 1], strides = [1, 1]} : vector<48x1xf32> to vector<8x1xf32>
    %331 = arith.addf %323, %330 : vector<8x1xf32>
    %c3_i32 = arith.constant 3 : i32
    %332 = vector.broadcast %c3_i32 : i32 to vector<8x128xi32>
    %333 = arith.cmpi eq, %304, %332 : vector<8x128xi32>
    %334 = vector.extract_strided_slice %307 {offsets = [24, 0], sizes = [8, 1], strides = [1, 1]} : vector<48x1xf32> to vector<8x1xf32>
    %335 = vector.shape_cast %334 : vector<8x1xf32> to vector<8x1xf32>
    %336 = vector.broadcast %335 : vector<8x1xf32> to vector<8x128xf32>
    %337 = arith.select %333, %336, %329 : vector<8x128xi1>, vector<8x128xf32>
    %338 = vector.extract_strided_slice %303 {offsets = [24, 0], sizes = [8, 1], strides = [1, 1]} : vector<48x1xf32> to vector<8x1xf32>
    %339 = arith.addf %331, %338 : vector<8x1xf32>
    %c4_i32 = arith.constant 4 : i32
    %340 = vector.broadcast %c4_i32 : i32 to vector<8x128xi32>
    %341 = arith.cmpi eq, %304, %340 : vector<8x128xi32>
    %342 = vector.extract_strided_slice %307 {offsets = [32, 0], sizes = [8, 1], strides = [1, 1]} : vector<48x1xf32> to vector<8x1xf32>
    %343 = vector.shape_cast %342 : vector<8x1xf32> to vector<8x1xf32>
    %344 = vector.broadcast %343 : vector<8x1xf32> to vector<8x128xf32>
    %345 = arith.select %341, %344, %337 : vector<8x128xi1>, vector<8x128xf32>
    %346 = vector.extract_strided_slice %303 {offsets = [32, 0], sizes = [8, 1], strides = [1, 1]} : vector<48x1xf32> to vector<8x1xf32>
    %347 = arith.addf %339, %346 : vector<8x1xf32>
    %c5_i32 = arith.constant 5 : i32
    %348 = vector.broadcast %c5_i32 : i32 to vector<8x128xi32>
    %349 = arith.cmpi eq, %304, %348 : vector<8x128xi32>
    %350 = vector.extract_strided_slice %307 {offsets = [40, 0], sizes = [8, 1], strides = [1, 1]} : vector<48x1xf32> to vector<8x1xf32>
    %351 = vector.shape_cast %350 : vector<8x1xf32> to vector<8x1xf32>
    %352 = vector.broadcast %351 : vector<8x1xf32> to vector<8x128xf32>
    %353 = arith.select %349, %352, %345 : vector<8x128xi1>, vector<8x128xf32>
    %354 = vector.extract_strided_slice %303 {offsets = [40, 0], sizes = [8, 1], strides = [1, 1]} : vector<48x1xf32> to vector<8x1xf32>
    %355 = arith.addf %347, %354 : vector<8x1xf32>
    %c6_i32 = arith.constant 6 : i32
    %356 = vector.broadcast %c6_i32 : i32 to vector<8x128xi32>
    %357 = arith.cmpi eq, %304, %356 : vector<8x128xi32>
    %358 = vector.shape_cast %355 : vector<8x1xf32> to vector<8x1xf32>
    %359 = vector.broadcast %358 : vector<8x1xf32> to vector<8x128xf32>
    %360 = arith.select %357, %359, %353 : vector<8x128xi1>, vector<8x128xf32>
    %c0_79 = arith.constant 0 : index
    %c0_80 = arith.constant 0 : index
    %361 = vector.load %arg7[%c0_79, %c0_80] : memref<8x128xf32, #tpu.memory_space<vmem>>, vector<8x128xf32>
    tpu.vector_store %arg7[%c0_79, %c0_80], %360 {strides = array<i32>} : memref<8x128xf32, #tpu.memory_space<vmem>>, vector<8x128xf32>,
    return
  }
}

</mosaic_0001>

<bundles_post_ra>
// kernel: forward_pallas.1
= control target key start
LH: loop header
LB: loop body
LE: loop exit
PB: predicated region body
PF: predicated region fallthrough
CT: control target
= control target key end

     0   :  { %v1615_v0 = vmov 0.0   ;;  %vm1616_vm0 = vmmov 0   ;;  %v1617_v3 = vmov 0   ;;  %s1618_s29 = smov 64   ;;  %s1619_s30 = smov 32   ;;  %vm64_vm1 = vcmask 261120   ;;  %s2070_s3 = inlined_call_operand.vmem [shape: bf16[32,128], index: 3, kind: input, shape index: {}]   ;;  %s2071_s0 = inlined_call_operand.vmem [shape: f32[48,128], index: 0, kind: input, shape index: {}]   ;;  %s2072_s4 = inlined_call_operand.vmem [shape: bf16[32,128], index: 4, kind: input, shape index: {}]   ;;  %s2073_s1 = inlined_call_operand.vmem [shape: f32[48,128], index: 1, kind: input, shape index: {}]   ;;  %s2074_s5 = inlined_call_operand.vmem [shape: bf16[32,128], index: 5, kind: input, shape index: {}]   ;;  %s2075_s6 = inlined_call_operand.vmem [shape: f32[1,128], index: 6, kind: input, shape index: {}]   ;;  %s2076_s2 = inlined_call_operand.vmem [shape: s32[48,1], index: 2, kind: input, shape index: {}]   ;;  %s2077_s7 = inlined_call_operand.vmem [shape: f32[8,128], index: 7, kind: output, shape index: {}]  }
   0x1   :  { %1395 = vmatprep.subr.bf16.mxu1 %v1615_v0  ;;  %v1665_v1 = vld [vmem:[%s2070_s3 + $0x8] sm:$0xff]   ;;  %1399 = vmatprep.mubr.msk.bf16.mxu1 %vm1616_vm0, %v1615_v0  ;;  %v1676_v2 = vld [vmem:[%s2070_s3] sm:$0xff]   ;;  %v29_v48 = vld [vmem:[%s2071_s0 + $0x10] sm:$0xff]  ;;  %s1620_s10 = smov 96  }
   0x2   :  { %1411 = vmatprep.subr.bf16.mxu0 %v1615_v0  ;;  %1415 = vmatprep.mubr.msk.bf16.mxu0 %vm1616_vm0, %v1615_v0  ;;  %v27_v4 = vld [vmem:[%s2071_s0] sm:$0xff]  ;;  %v28_v26 = vld [vmem:[%s2071_s0 + $0x8] sm:$0xff] }
   0x3   :  { %1396 = vmatpush3.bf16.msra.mxu1 %v1665_v1  ;;  %1412 = vmatpush3.bf16.msra.mxu0 %v1665_v1 }
   0x4   :  { %1397 = vmatprep.subr.bf16.mxu1 %v1615_v0  ;;  %1413 = vmatprep.subr.bf16.mxu0 %v1615_v0 }
   0x5   :  { %1513 = vset.pattern.permute.xlu1 %v1617_v3  ;;  %1514 = vset.pattern.permute.xlu0 %v1617_v3 }
   0x7   :  { %1398 = vmatpush3.bf16.msra.mxu1 %v1676_v2  ;;  %1414 = vmatpush3.bf16.msra.mxu0 %v1676_v2 }
   0x8   :  { %1403 = vmatprep.subr.bf16.mxu1 %v1615_v0  ;;  %1427 = vmatprep.subr.bf16.mxu0 %v1615_v0 }
   0xa   :  { %1400 = vmatmul.mubr.bf16.vlgmr.msra.gmra.mxu1 %v1617_v3 }
   0xb   :  { %1404 = vmatpush3.bf16.msra.mxu1 %v1665_v1  ;;  %1407 = vmatprep.mubr.msk.bf16.mxu1 %vm1616_vm0, %v1615_v0 }
   0xc   :  { %1405 = vmatprep.subr.bf16.mxu1 %v1615_v0 }
   0xf   :  { %1406 = vmatpush3.bf16.msra.mxu1 %v1676_v2 }
  0x10   :  { %1419 = vmatprep.subr.bf16.mxu1 %v1615_v0 }
  0xca   :  { %v102_v5 = vpop.f32.mrf.mxu1 }
  0xcb   :  { %v108_v6 = vadd.f32 %v102_v5, %v27_v4 }
  0xcc   :  { %v1401_v7 = vpop.f32.mrf.mxu1 }
  0xcd   :  { %v1311_v8 = vmul.f32 -1.442695, %v108_v6 }
  0xce   :  { %v105_v9 = vpop.f32.mrf.mxu1 }
  0xcf   :  { %1521 = vpow2.f32 %v1311_v8  ;;  %v30_v9 = vld [vmem:[%s2071_s0 + $0x18] sm:$0xff] }
  0xd0   :  { %v1402_v10 = vpop.f32.mrf.mxu1 }
  0xdc   :  { %v1522_v11 = vpop.eup %1521 }
  0xdd   :  { %v112_v12 = vadd.f32 1.0, %v1522_v11 }
  0xdf   :  { %1523 = vrcp.f32 %v112_v12 }
  0xec   :  { %v1524_v13 = vpop.eup %1523 }
  0xed   :  { %v115_v14 = vmul.f32 2.0, %v1524_v13  ;;  %v117_v18 = vmul.f32 0.0, %v1524_v13 }
  0xef   :  { %v1312_v15 = vadd.f32 -1.0, %v115_v14 }
  0xf1   :  { %119 = vrot.lane.b32.xlu0 %v1312_v15, %s1618_s29 }
 0x163   :  { %v120_v16 = vpop.permute.xlu0 %119 }
 0x164   :  { %v122_v17 = vmul.f32 %v1524_v13, %v120_v16 }
 0x166   :  { %124 = vrot.lane.b32.xlu0 %v122_v17, %s1619_s30 }
 0x1d8   :  { %v125_v19 = vpop.permute.xlu0 %124 }
 0x1d9   :  { %v127_v20 = vadd.f32 %v125_v19, %v117_v18 }
 0x1db   :  { %1525 = vtanh.f32 %v127_v20 }
 0x1e8   :  { %v1526_v21 = vpop.eup %1525 }
 0x1e9   :  { %130 = vrot.lane.b32.xlu1 %v1526_v21, %s1618_s29 }
 0x25b   :  { %v131_v22 = vpop.permute.xlu1 %130 }
 0x25c   :  { %v133_v23 = vmul.f32 %v1524_v13, %v131_v22 }
 0x25e   :  { %v134_v24 = vpack.c.bf16 %v133_v23, %v133_v23 }
 0x260   :  { %136 = vrot.lane.b32.xlu1 %v134_v24, %s1619_s30 }
 0x2d2   :  { %v137_v25 = vpop.permute.xlu1 %136 }
 0x2d3   :  { %1408 = vmatmul.mubr.msk.bf16.vlgmr.msra.gmra.mxu1 %vm64_vm1, %v137_v25 }
 0x2d4   :  { %1420 = vmatpush3.bf16.msra.mxu1 %v1665_v1  ;;  %1423 = vmatprep.mubr.msk.bf16.mxu1 %vm1616_vm0, %v1615_v0 }
 0x2d5   :  { %1421 = vmatprep.subr.bf16.mxu1 %v1615_v0 }
 0x2d8   :  { %1422 = vmatpush3.bf16.msra.mxu1 %v1676_v2 }
 0x2d9   :  { %1435 = vmatprep.subr.bf16.mxu1 %v1615_v0 }
 0x393   :  { %v175_v27 = vpop.f32.mrf.mxu1 }
 0x394   :  { %v181_v28 = vadd.f32 %v175_v27, %v28_v26 }
 0x395   :  { %v1409_v29 = vpop.f32.mrf.mxu1 }
 0x396   :  { %v1314_v30 = vmul.f32 -1.442695, %v181_v28  ;;  %v31_v29 = vld [vmem:[%s2071_s0 + $0x20] sm:$0xff] }
 0x397   :  { %v178_v31 = vpop.f32.mrf.mxu1 }
 0x398   :  { %1527 = vpow2.f32 %v1314_v30 }
 0x399   :  { %v1410_v32 = vpop.f32.mrf.mxu1 }
 0x3a5   :  { %v1528_v33 = vpop.eup %1527 }
 0x3a6   :  { %v185_v34 = vadd.f32 1.0, %v1528_v33 }
 0x3a8   :  { %1529 = vrcp.f32 %v185_v34 }
 0x3b5   :  { %v1530_v35 = vpop.eup %1529 }
 0x3b6   :  { %v188_v36 = vmul.f32 2.0, %v1530_v35  ;;  %v190_v40 = vmul.f32 %v1530_v35, %v127_v20 }
 0x3b8   :  { %v1315_v37 = vadd.f32 -1.0, %v188_v36 }
 0x3ba   :  { %192 = vrot.lane.b32.xlu0 %v1315_v37, %s1618_s29 }
 0x42c   :  { %v193_v38 = vpop.permute.xlu0 %192 }
 0x42d   :  { %v195_v39 = vmul.f32 %v1530_v35, %v193_v38 }
 0x42f   :  { %197 = vrot.lane.b32.xlu1 %v195_v39, %s1619_s30 }
 0x4a1   :  { %v198_v41 = vpop.permute.xlu1 %197 }
 0x4a2   :  { %v200_v42 = vadd.f32 %v198_v41, %v190_v40 }
 0x4a4   :  { %1531 = vtanh.f32 %v200_v42 }
 0x4b1   :  { %v1532_v43 = vpop.eup %1531 }
 0x4b2   :  { %203 = vrot.lane.b32.xlu0 %v1532_v43, %s1618_s29 }
 0x524   :  { %v204_v44 = vpop.permute.xlu0 %203 }
 0x525   :  { %v206_v45 = vmul.f32 %v1530_v35, %v204_v44 }
 0x527   :  { %v207_v46 = vpack.c.bf16 %v206_v45, %v206_v45 }
 0x529   :  { %209 = vrot.lane.b32.xlu1 %v207_v46, %s1619_s30 }
 0x59b   :  { %v210_v47 = vpop.permute.xlu1 %209 }
 0x59c   :  { %1416 = vmatmul.mubr.msk.bf16.vlgmr.msra.gmra.mxu0 %vm64_vm1, %v210_v47 }
 0x59d   :  { %1428 = vmatpush3.bf16.msra.mxu0 %v1665_v1  ;;  %1431 = vmatprep.mubr.msk.bf16.mxu0 %vm1616_vm0, %v1615_v0 }
 0x59e   :  { %1429 = vmatprep.subr.bf16.mxu0 %v1615_v0 }
 0x5a1   :  { %1430 = vmatpush3.bf16.msra.mxu0 %v1676_v2 }
 0x5a2   :  { %1443 = vmatprep.subr.bf16.mxu0 %v1615_v0 }
 0x65c   :  { %v248_v49 = vpop.f32.mrf.mxu0 }
 0x65d   :  { %v254_v50 = vadd.f32 %v248_v49, %v29_v48 }
 0x65e   :  { %v1417_v51 = vpop.f32.mrf.mxu0 }
 0x65f   :  { %v1317_v52 = vmul.f32 -1.442695, %v254_v50  ;;  %v32_v51 = vld [vmem:[%s2071_s0 + $0x28] sm:$0xff] }
 0x660   :  { %v251_v53 = vpop.f32.mrf.mxu0 }
 0x661   :  { %1533 = vpow2.f32 %v1317_v52 }
 0x662   :  { %v1418_v54 = vpop.f32.mrf.mxu0 }
 0x66e   :  { %v1534_v55 = vpop.eup %1533 }
 0x66f   :  { %v258_v56 = vadd.f32 1.0, %v1534_v55 }
 0x671   :  { %1535 = vrcp.f32 %v258_v56 }
 0x67e   :  { %v1536_v57 = vpop.eup %1535 }
 0x67f   :  { %v261_v58 = vmul.f32 2.0, %v1536_v57  ;;  %v263_v62 = vmul.f32 %v1536_v57, %v200_v42 }
 0x681   :  { %v1318_v59 = vadd.f32 -1.0, %v261_v58 }
 0x683   :  { %265 = vrot.lane.b32.xlu0 %v1318_v59, %s1618_s29 }
 0x6f5   :  { %v266_v60 = vpop.permute.xlu0 %265 }
 0x6f6   :  { %v268_v61 = vmul.f32 %v1536_v57, %v266_v60 }
 0x6f8   :  { %270 = vrot.lane.b32.xlu1 %v268_v61, %s1619_s30 }
 0x76a   :  { %v271_v63 = vpop.permute.xlu1 %270 }
 0x76b   :  { %v273_v3 = vadd.f32 %v271_v63, %v263_v62 }
 0x76d   :  { %1537 = vtanh.f32 %v273_v3 }
 0x77a   :  { %v1538_v4 = vpop.eup %1537 }
 0x77b   :  { %276 = vrot.lane.b32.xlu0 %v1538_v4, %s1618_s29 }
 0x7ed   :  { %v277_v5 = vpop.permute.xlu0 %276 }
 0x7ee   :  { %v279_v6 = vmul.f32 %v1536_v57, %v277_v5 }
 0x7f0   :  { %v280_v7 = vpack.c.bf16 %v279_v6, %v279_v6 }
 0x7f2   :  { %282 = vrot.lane.b32.xlu1 %v280_v7, %s1619_s30  ;;  %v1761_v7 = vld [vmem:[%s2072_s4 + $0x8] sm:$0xff]  }
 0x864   :  { %v283_v8 = vpop.permute.xlu1 %282 }
 0x865   :  { %1424 = vmatmul.mubr.msk.bf16.vlgmr.msra.gmra.mxu1 %vm64_vm1, %v283_v8  ;;  %v1767_v8 = vld [vmem:[%s2072_s4] sm:$0xff]  }
 0x866   :  { %1436 = vmatpush3.bf16.msra.mxu1 %v1665_v1  ;;  %1439 = vmatprep.mubr.msk.bf16.mxu1 %vm1616_vm0, %v1615_v0 }
 0x867   :  { %1437 = vmatprep.subr.bf16.mxu1 %v1615_v0 }
 0x86a   :  { %1438 = vmatpush3.bf16.msra.mxu1 %v1676_v2 }
 0x86b   :  { %1451 = vmatprep.subr.bf16.mxu1 %v1615_v0 }
 0x925   :  { %v321_v10 = vpop.f32.mrf.mxu1 }
 0x926   :  { %v327_v11 = vadd.f32 %v321_v10, %v30_v9 }
 0x927   :  { %v1425_v12 = vpop.f32.mrf.mxu1 }
 0x928   :  { %v1320_v13 = vmul.f32 -1.442695, %v327_v11 }
 0x929   :  { %v324_v14 = vpop.f32.mrf.mxu1 }
 0x92a   :  { %1539 = vpow2.f32 %v1320_v13  ;;  %v33_v14 = vld [vmem:[%s2073_s1] sm:$0xff] }
 0x92b   :  { %v1426_v1 = vpop.f32.mrf.mxu1 }
 0x937   :  { %v1540_v15 = vpop.eup %1539 }
 0x938   :  { %v331_v16 = vadd.f32 1.0, %v1540_v15 }
 0x93a   :  { %1541 = vrcp.f32 %v331_v16 }
 0x947   :  { %v1542_v17 = vpop.eup %1541 }
 0x948   :  { %v334_v18 = vmul.f32 2.0, %v1542_v17  ;;  %v336_v21 = vmul.f32 %v1542_v17, %v273_v3 }
 0x94a   :  { %v1321_v19 = vadd.f32 -1.0, %v334_v18 }
 0x94c   :  { %338 = vrot.lane.b32.xlu0 %v1321_v19, %s1618_s29 }
 0x9be   :  { %v339_v2 = vpop.permute.xlu0 %338 }
 0x9bf   :  { %v341_v20 = vmul.f32 %v1542_v17, %v339_v2 }
 0x9c1   :  { %343 = vrot.lane.b32.xlu1 %v341_v20, %s1619_s30 }
 0xa33   :  { %v344_v22 = vpop.permute.xlu1 %343 }
 0xa34   :  { %v346_v23 = vadd.f32 %v344_v22, %v336_v21 }
 0xa36   :  { %1543 = vtanh.f32 %v346_v23 }
 0xa43   :  { %v1544_v24 = vpop.eup %1543 }
 0xa44   :  { %349 = vrot.lane.b32.xlu0 %v1544_v24, %s1618_s29 }
 0xab6   :  { %v350_v25 = vpop.permute.xlu0 %349 }
 0xab7   :  { %v352_v26 = vmul.f32 %v1542_v17, %v350_v25 }
 0xab9   :  { %v353_v27 = vpack.c.bf16 %v352_v26, %v352_v26 }
 0xabb   :  { %355 = vrot.lane.b32.xlu1 %v353_v27, %s1619_s30 }
 0xb2d   :  { %v356_v28 = vpop.permute.xlu1 %355 }
 0xb2e   :  { %1432 = vmatmul.mubr.msk.bf16.vlgmr.msra.gmra.mxu0 %vm64_vm1, %v356_v28 }
 0xb2f   :  { %1447 = vmatprep.mubr.msk.bf16.mxu0 %vm1616_vm0, %v1615_v0  ;;  %1444 = vmatpush3.bf16.msra.mxu0 %v1761_v7 }
 0xb30   :  { %1445 = vmatprep.subr.bf16.mxu0 %v1615_v0 }
 0xb33   :  { %1446 = vmatpush3.bf16.msra.mxu0 %v1767_v8 }
 0xb34   :  { %1459 = vmatprep.subr.bf16.mxu0 %v1615_v0 }
 0xbee   :  { %v394_v30 = vpop.f32.mrf.mxu0 }
 0xbef   :  { %v400_v31 = vadd.f32 %v394_v30, %v31_v29 }
 0xbf0   :  { %v1433_v32 = vpop.f32.mrf.mxu0 }
 0xbf1   :  { %v1323_v33 = vmul.f32 -1.442695, %v400_v31 }
 0xbf2   :  { %v397_v34 = vpop.f32.mrf.mxu0 }
 0xbf3   :  { %1545 = vpow2.f32 %v1323_v33  ;;  %v34_v34 = vld [vmem:[%s2073_s1 + $0x8] sm:$0xff] }
 0xbf4   :  { %v1434_v35 = vpop.f32.mrf.mxu0 }
 0xc00   :  { %v1546_v36 = vpop.eup %1545 }
 0xc01   :  { %v404_v37 = vadd.f32 1.0, %v1546_v36 }
 0xc03   :  { %1547 = vrcp.f32 %v404_v37 }
 0xc10   :  { %v1548_v38 = vpop.eup %1547 }
 0xc11   :  { %v407_v39 = vmul.f32 2.0, %v1548_v38  ;;  %v409_v43 = vmul.f32 %v1548_v38, %v346_v23 }
 0xc13   :  { %v1324_v40 = vadd.f32 -1.0, %v407_v39 }
 0xc15   :  { %411 = vrot.lane.b32.xlu0 %v1324_v40, %s1618_s29 }
 0xc87   :  { %v412_v41 = vpop.permute.xlu0 %411 }
 0xc88   :  { %v414_v42 = vmul.f32 %v1548_v38, %v412_v41 }
 0xc8a   :  { %416 = vrot.lane.b32.xlu1 %v414_v42, %s1619_s30 }
 0xcfc   :  { %v417_v44 = vpop.permute.xlu1 %416 }
 0xcfd   :  { %v419_v45 = vadd.f32 %v417_v44, %v409_v43 }
 0xcff   :  { %1549 = vtanh.f32 %v419_v45 }
 0xd0c   :  { %v1550_v46 = vpop.eup %1549 }
 0xd0d   :  { %422 = vrot.lane.b32.xlu0 %v1550_v46, %s1618_s29 }
 0xd7f   :  { %v423_v47 = vpop.permute.xlu0 %422 }
 0xd80   :  { %v425_v48 = vmul.f32 %v1548_v38, %v423_v47 }
 0xd82   :  { %v426_v49 = vpack.c.bf16 %v425_v48, %v425_v48 }
 0xd84   :  { %428 = vrot.lane.b32.xlu1 %v426_v49, %s1619_s30 }
 0xdf6   :  { %v429_v50 = vpop.permute.xlu1 %428 }
 0xdf7   :  { %1440 = vmatmul.mubr.msk.bf16.vlgmr.msra.gmra.mxu1 %vm64_vm1, %v429_v50 }
 0xdf8   :  { %1455 = vmatprep.mubr.msk.bf16.mxu1 %vm1616_vm0, %v1615_v0  ;;  %1452 = vmatpush3.bf16.msra.mxu1 %v1761_v7 }
 0xdf9   :  { %1453 = vmatprep.subr.bf16.mxu1 %v1615_v0 }
 0xdfc   :  { %1454 = vmatpush3.bf16.msra.mxu1 %v1767_v8 }
 0xdfd   :  { %1467 = vmatprep.subr.bf16.mxu1 %v1615_v0 }
 0xeb7   :  { %v467_v52 = vpop.f32.mrf.mxu1 }
 0xeb8   :  { %v473_v53 = vadd.f32 %v467_v52, %v32_v51 }
 0xeb9   :  { %v1441_v54 = vpop.f32.mrf.mxu1 }
 0xeba   :  { %v1326_v55 = vmul.f32 -1.442695, %v473_v53 }
 0xebb   :  { %v470_v56 = vpop.f32.mrf.mxu1 }
 0xebc   :  { %1551 = vpow2.f32 %v1326_v55  ;;  %v35_v56 = vld [vmem:[%s2073_s1 + $0x10] sm:$0xff] }
 0xebd   :  { %v1442_v57 = vpop.f32.mrf.mxu1 }
 0xec9   :  { %v1552_v58 = vpop.eup %1551 }
 0xeca   :  { %v477_v59 = vadd.f32 1.0, %v1552_v58 }
 0xecc   :  { %1553 = vrcp.f32 %v477_v59 }
 0xed9   :  { %v1554_v60 = vpop.eup %1553 }
 0xeda   :  { %v480_v61 = vmul.f32 2.0, %v1554_v60  ;;  %v482_v4 = vmul.f32 %v1554_v60, %v419_v45 }
 0xedc   :  { %v1327_v62 = vadd.f32 -1.0, %v480_v61 }
 0xede   :  { %484 = vrot.lane.b32.xlu0 %v1327_v62, %s1618_s29 }
 0xf50   :  { %v485_v63 = vpop.permute.xlu0 %484 }
 0xf51   :  { %v487_v3 = vmul.f32 %v1554_v60, %v485_v63 }
 0xf53   :  { %489 = vrot.lane.b32.xlu1 %v487_v3, %s1619_s30 }
 0xfc5   :  { %v490_v5 = vpop.permute.xlu1 %489 }
 0xfc6   :  { %v492_v6 = vadd.f32 %v490_v5, %v482_v4 }
 0xfc8   :  { %1555 = vtanh.f32 %v492_v6 }
 0xfd5   :  { %v1556_v9 = vpop.eup %1555 }
 0xfd6   :  { %495 = vrot.lane.b32.xlu0 %v1556_v9, %s1618_s29 }
0x1048   :  { %v496_v10 = vpop.permute.xlu0 %495 }
0x1049   :  { %v498_v11 = vmul.f32 %v1554_v60, %v496_v10 }
0x104b   :  { %v499_v12 = vpack.c.bf16 %v498_v11, %v498_v11 }
0x104d   :  { %501 = vrot.lane.b32.xlu1 %v499_v12, %s1619_s30 }
0x10bf   :  { %v502_v13 = vpop.permute.xlu1 %501 }
0x10c0   :  { %1448 = vmatmul.mubr.msk.bf16.vlgmr.msra.gmra.mxu0 %vm64_vm1, %v502_v13 }
0x10c1   :  { %1460 = vmatpush3.bf16.msra.mxu0 %v1761_v7  ;;  %1463 = vmatprep.mubr.msk.bf16.mxu0 %vm1616_vm0, %v1615_v0 }
0x10c2   :  { %1461 = vmatprep.subr.bf16.mxu0 %v1615_v0 }
0x10c5   :  { %1462 = vmatpush3.bf16.msra.mxu0 %v1767_v8 }
0x10c6   :  { %1475 = vmatprep.subr.bf16.mxu0 %v1615_v0 }
0x1180   :  { %v552_v1 = vpop.f32.mrf.mxu0 }
0x1181   :  { %v558_v15 = vadd.f32 %v552_v1, %v33_v14 }
0x1182   :  { %v1449_v16 = vpop.f32.mrf.mxu0 }
0x1183   :  { %v1331_v17 = vmul.f32 -1.442695, %v558_v15 }
0x1184   :  { %v555_v18 = vpop.f32.mrf.mxu0 }
0x1185   :  { %1557 = vpow2.f32 %v1331_v17  ;;  %v36_v18 = vld [vmem:[%s2073_s1 + $0x18] sm:$0xff] }
0x1186   :  { %v1450_v19 = vpop.f32.mrf.mxu0 }
0x1192   :  { %v1558_v2 = vpop.eup %1557 }
0x1193   :  { %v562_v20 = vadd.f32 1.0, %v1558_v2 }
0x1195   :  { %1559 = vrcp.f32 %v562_v20 }
0x11a2   :  { %v1560_v21 = vpop.eup %1559 }
0x11a3   :  { %v565_v22 = vmul.f32 2.0, %v1560_v21  ;;  %v567_v26 = vmul.f32 %v1560_v21, %v492_v6 }
0x11a5   :  { %v1332_v23 = vadd.f32 -1.0, %v565_v22 }
0x11a7   :  { %569 = vrot.lane.b32.xlu0 %v1332_v23, %s1618_s29 }
0x1219   :  { %v570_v24 = vpop.permute.xlu0 %569 }
0x121a   :  { %v572_v25 = vmul.f32 %v1560_v21, %v570_v24 }
0x121c   :  { %574 = vrot.lane.b32.xlu1 %v572_v25, %s1619_s30 }
0x128e   :  { %v575_v27 = vpop.permute.xlu1 %574 }
0x128f   :  { %v1790_v28 = vadd.f32 %v575_v27, %v567_v26 }
0x1291   :  { %1561 = vtanh.f32 %v1790_v28 }
0x129e   :  { %v1562_v29 = vpop.eup %1561 }
0x129f   :  { %580 = vrot.lane.b32.xlu0 %v1562_v29, %s1618_s29 }
0x1311   :  { %v581_v30 = vpop.permute.xlu0 %580 }
0x1312   :  { %v583_v31 = vmul.f32 %v1560_v21, %v581_v30 }
0x1314   :  { %v589_v32 = vpack.c.bf16 %v583_v31, %v583_v31 }
0x1316   :  { %591 = vrot.lane.b32.xlu1 %v589_v32, %s1619_s30 }
0x1388   :  { %v592_v33 = vpop.permute.xlu1 %591 }
0x1389   :  { %1456 = vmatmul.mubr.msk.bf16.vlgmr.msra.gmra.mxu1 %vm64_vm1, %v592_v33 }
0x138a   :  { %1468 = vmatpush3.bf16.msra.mxu1 %v1761_v7  ;;  %1471 = vmatprep.mubr.msk.bf16.mxu1 %vm1616_vm0, %v1615_v0 }
0x138b   :  { %1469 = vmatprep.subr.bf16.mxu1 %v1615_v0 }
0x138e   :  { %1470 = vmatpush3.bf16.msra.mxu1 %v1767_v8 }
0x138f   :  { %1483 = vmatprep.subr.bf16.mxu1 %v1615_v0 }
0x1449   :  { %v630_v35 = vpop.f32.mrf.mxu1 }
0x144a   :  { %v636_v36 = vadd.f32 %v630_v35, %v34_v34 }
0x144b   :  { %v1457_v37 = vpop.f32.mrf.mxu1 }
0x144c   :  { %v1334_v38 = vmul.f32 -1.442695, %v636_v36 }
0x144d   :  { %v633_v39 = vpop.f32.mrf.mxu1 }
0x144e   :  { %1563 = vpow2.f32 %v1334_v38  ;;  %v37_v38 = vld [vmem:[%s2073_s1 + $0x20] sm:$0xff] }
0x144f   :  { %v1458_v40 = vpop.f32.mrf.mxu1 }
0x145b   :  { %v1564_v41 = vpop.eup %1563 }
0x145c   :  { %v640_v42 = vadd.f32 1.0, %v1564_v41 }
0x145e   :  { %1565 = vrcp.f32 %v640_v42 }
0x146b   :  { %v1566_v43 = vpop.eup %1565 }
0x146c   :  { %v643_v44 = vmul.f32 2.0, %v1566_v43  ;;  %v645_v48 = vmul.f32 %v1566_v43, %v1790_v28 }
0x146e   :  { %v1335_v45 = vadd.f32 -1.0, %v643_v44 }
0x1470   :  { %647 = vrot.lane.b32.xlu0 %v1335_v45, %s1618_s29 }
0x14e2   :  { %v648_v46 = vpop.permute.xlu0 %647 }
0x14e3   :  { %v650_v47 = vmul.f32 %v1566_v43, %v648_v46 }
0x14e5   :  { %652 = vrot.lane.b32.xlu1 %v650_v47, %s1619_s30 }
0x1557   :  { %v653_v49 = vpop.permute.xlu1 %652 }
0x1558   :  { %v1808_v50 = vadd.f32 %v653_v49, %v645_v48 }
0x155a   :  { %1567 = vtanh.f32 %v1808_v50 }
0x1567   :  { %v1568_v51 = vpop.eup %1567 }
0x1568   :  { %658 = vrot.lane.b32.xlu0 %v1568_v51, %s1618_s29 }
0x15da   :  { %v659_v52 = vpop.permute.xlu0 %658 }
0x15db   :  { %v661_v53 = vmul.f32 %v1566_v43, %v659_v52 }
0x15dd   :  { %v667_v54 = vpack.c.bf16 %v661_v53, %v661_v53 }
0x15df   :  { %669 = vrot.lane.b32.xlu1 %v667_v54, %s1619_s30 }
0x1651   :  { %v670_v55 = vpop.permute.xlu1 %669 }
0x1652   :  { %1464 = vmatmul.mubr.msk.bf16.vlgmr.msra.gmra.mxu0 %vm64_vm1, %v670_v55 }
0x1653   :  { %1476 = vmatpush3.bf16.msra.mxu0 %v1761_v7  ;;  %1479 = vmatprep.mubr.msk.bf16.mxu0 %vm1616_vm0, %v1615_v0 }
0x1654   :  { %1477 = vmatprep.subr.bf16.mxu0 %v1615_v0 }
0x1657   :  { %1478 = vmatpush3.bf16.msra.mxu0 %v1767_v8 }
0x1658   :  { %1491 = vmatprep.subr.bf16.mxu0 %v1615_v0 }
0x1712   :  { %v708_v57 = vpop.f32.mrf.mxu0 }
0x1713   :  { %v714_v58 = vadd.f32 %v708_v57, %v35_v56 }
0x1714   :  { %v1465_v59 = vpop.f32.mrf.mxu0 }
0x1715   :  { %v1337_v60 = vmul.f32 -1.442695, %v714_v58 }
0x1716   :  { %v711_v61 = vpop.f32.mrf.mxu0 }
0x1717   :  { %1569 = vpow2.f32 %v1337_v60  ;;  %v38_v61 = vld [vmem:[%s2073_s1 + $0x28] sm:$0xff] }
0x1718   :  { %v1466_v62 = vpop.f32.mrf.mxu0 }
0x1724   :  { %v1570_v63 = vpop.eup %1569 }
0x1725   :  { %v718_v3 = vadd.f32 1.0, %v1570_v63 }
0x1727   :  { %1571 = vrcp.f32 %v718_v3 }
0x1734   :  { %v1572_v4 = vpop.eup %1571 }
0x1735   :  { %v721_v5 = vmul.f32 2.0, %v1572_v4  ;;  %v723_v11 = vmul.f32 %v1572_v4, %v1808_v50 }
0x1737   :  { %v1338_v6 = vadd.f32 -1.0, %v721_v5 }
0x1739   :  { %725 = vrot.lane.b32.xlu0 %v1338_v6, %s1618_s29 }
0x17ab   :  { %v726_v9 = vpop.permute.xlu0 %725 }
0x17ac   :  { %v728_v10 = vmul.f32 %v1572_v4, %v726_v9 }
0x17ae   :  { %730 = vrot.lane.b32.xlu1 %v728_v10, %s1619_s30 }
0x1820   :  { %v731_v12 = vpop.permute.xlu1 %730 }
0x1821   :  { %v1826_v13 = vadd.f32 %v731_v12, %v723_v11 }
0x1823   :  { %1573 = vtanh.f32 %v1826_v13 }
0x1830   :  { %v1574_v14 = vpop.eup %1573 }
0x1831   :  { %736 = vrot.lane.b32.xlu0 %v1574_v14, %s1618_s29 }
0x18a3   :  { %v737_v1 = vpop.permute.xlu0 %736 }
0x18a4   :  { %v739_v15 = vmul.f32 %v1572_v4, %v737_v1  ;;  %v1519_v1 = vld [vmem:[%s2074_s5 + $0x8] sm:$0xff]  }
0x18a6   :  { %v745_v16 = vpack.c.bf16 %v739_v15, %v739_v15  ;;  %v1520_v15 = vld [vmem:[%s2074_s5] sm:$0xff]  }
0x18a8   :  { %747 = vrot.lane.b32.xlu1 %v745_v16, %s1619_s30 }
0x191a   :  { %v748_v17 = vpop.permute.xlu1 %747 }
0x191b   :  { %1472 = vmatmul.mubr.msk.bf16.vlgmr.msra.gmra.mxu1 %vm64_vm1, %v748_v17 }
0x191c   :  { %1484 = vmatpush3.bf16.msra.mxu1 %v1761_v7  ;;  %1487 = vmatprep.mubr.msk.bf16.mxu1 %vm1616_vm0, %v1615_v0 }
0x191d   :  { %1485 = vmatprep.subr.bf16.mxu1 %v1615_v0 }
0x1920   :  { %1486 = vmatpush3.bf16.msra.mxu1 %v1767_v8 }
0x19db   :  { %v786_v19 = vpop.f32.mrf.mxu1 }
0x19dc   :  { %v792_v2 = vadd.f32 %v786_v19, %v36_v18 }
0x19dd   :  { %v1473_v20 = vpop.f32.mrf.mxu1 }
0x19de   :  { %v1340_v21 = vmul.f32 -1.442695, %v792_v2 }
0x19df   :  { %v789_v22 = vpop.f32.mrf.mxu1 }
0x19e0   :  { %1575 = vpow2.f32 %v1340_v21 }
0x19e1   :  { %v1474_v23 = vpop.f32.mrf.mxu1 }
0x19ed   :  { %v1576_v24 = vpop.eup %1575 }
0x19ee   :  { %v796_v7 = vadd.f32 1.0, %v1576_v24 }
0x19f0   :  { %1577 = vrcp.f32 %v796_v7 }
0x19fd   :  { %v1578_v25 = vpop.eup %1577 }
0x19fe   :  { %v799_v26 = vmul.f32 2.0, %v1578_v25  ;;  %v801_v30 = vmul.f32 %v1578_v25, %v1826_v13 }
0x1a00   :  { %v1341_v27 = vadd.f32 -1.0, %v799_v26 }
0x1a02   :  { %803 = vrot.lane.b32.xlu0 %v1341_v27, %s1618_s29 }
0x1a74   :  { %v804_v8 = vpop.permute.xlu0 %803 }
0x1a75   :  { %v806_v29 = vmul.f32 %v1578_v25, %v804_v8 }
0x1a77   :  { %808 = vrot.lane.b32.xlu1 %v806_v29, %s1619_s30 }
0x1ae9   :  { %v809_v31 = vpop.permute.xlu1 %808 }
0x1aea   :  { %v1843_v32 = vadd.f32 %v809_v31, %v801_v30  ;;  %v1348_v31 = vld [vmem:[%s2075_s6] ss:$0 sm:$0xff] }
0x1aec   :  { %1579 = vtanh.f32 %v1843_v32 }
0x1af9   :  { %v1580_v33 = vpop.eup %1579 }
0x1afa   :  { %814 = vrot.lane.b32.xlu0 %v1580_v33, %s1618_s29 }
0x1b6c   :  { %v815_v34 = vpop.permute.xlu0 %814 }
0x1b6d   :  { %v817_v35 = vmul.f32 %v1578_v25, %v815_v34 }
0x1b6f   :  { %v823_v36 = vpack.c.bf16 %v817_v35, %v817_v35 }
0x1b71   :  { %825 = vrot.lane.b32.xlu1 %v823_v36, %s1619_s30 }
0x1be3   :  { %v826_v37 = vpop.permute.xlu1 %825 }
0x1be4   :  { %1480 = vmatmul.mubr.msk.bf16.vlgmr.msra.gmra.mxu0 %vm64_vm1, %v826_v37 }
0x1be5   :  { %1495 = vmatprep.mubr.msk.bf16.mxu0 %vm1616_vm0, %v1615_v0  ;;  %1492 = vmatpush3.bf16.msra.mxu0 %v1519_v1 }
0x1be6   :  { %1493 = vmatprep.subr.bf16.mxu0 %v1615_v0 }
0x1be9   :  { %1494 = vmatpush3.bf16.msra.mxu0 %v1520_v15 }
0x1ca4   :  { %v864_v39 = vpop.f32.mrf.mxu0 }
0x1ca5   :  { %v870_v40 = vadd.f32 %v864_v39, %v37_v38 }
0x1ca6   :  { %v1481_v41 = vpop.f32.mrf.mxu0 }
0x1ca7   :  { %v1343_v42 = vmul.f32 -1.442695, %v870_v40 }
0x1ca8   :  { %v867_v43 = vpop.f32.mrf.mxu0 }
0x1ca9   :  { %1581 = vpow2.f32 %v1343_v42 }
0x1caa   :  { %v1482_v44 = vpop.f32.mrf.mxu0 }
0x1cb6   :  { %v1582_v45 = vpop.eup %1581 }
0x1cb7   :  { %v874_v46 = vadd.f32 1.0, %v1582_v45 }
0x1cb9   :  { %1583 = vrcp.f32 %v874_v46 }
0x1cc6   :  { %v1584_v47 = vpop.eup %1583 }
0x1cc7   :  { %v877_v48 = vmul.f32 2.0, %v1584_v47  ;;  %v879_v53 = vmul.f32 %v1584_v47, %v1843_v32 }
0x1cc9   :  { %v1344_v49 = vadd.f32 -1.0, %v877_v48 }
0x1ccb   :  { %881 = vrot.lane.b32.xlu0 %v1344_v49, %s1618_s29  ;;  %v1066_v49 = vlaneseq }
0x1d3d   :  { %v882_v51 = vpop.permute.xlu0 %881 }
0x1d3e   :  { %v884_v52 = vmul.f32 %v1584_v47, %v882_v51  ;;  %v1910_v51 = vand.u32 127, %v1066_v49 }
0x1d40   :  { %886 = vrot.lane.b32.xlu1 %v884_v52, %s1619_s30 }
0x1db2   :  { %v887_v54 = vpop.permute.xlu1 %886 }
0x1db3   :  { %v889_v55 = vadd.f32 %v887_v54, %v879_v53 }
0x1db5   :  { %1585 = vtanh.f32 %v889_v55 }
0x1dc2   :  { %v1586_v56 = vpop.eup %1585 }
0x1dc3   :  { %892 = vrot.lane.b32.xlu0 %v1586_v56, %s1618_s29 }
0x1e35   :  { %v893_v57 = vpop.permute.xlu0 %892 }
0x1e36   :  { %v895_v58 = vmul.f32 %v1584_v47, %v893_v57 }
0x1e38   :  { %v901_v59 = vpack.c.bf16 %v895_v58, %v895_v58 }
0x1e3a   :  { %903 = vrot.lane.b32.xlu1 %v901_v59, %s1619_s30 }
0x1eac   :  { %v904_v60 = vpop.permute.xlu1 %903 }
0x1ead   :  { %1488 = vmatmul.mubr.msk.bf16.vlgmr.msra.gmra.mxu1 %vm64_vm1, %v904_v60 }
0x1f6d   :  { %v942_v62 = vpop.f32.mrf.mxu1 }
0x1f6e   :  { %v948_v63 = vadd.f32 %v942_v62, %v38_v61 }
0x1f6f   :  { %v1489_v3 = vpop.f32.mrf.mxu1 }
0x1f70   :  { %v1346_v4 = vmul.f32 -1.442695, %v948_v63 }
0x1f71   :  { %v945_v5 = vpop.f32.mrf.mxu1 }
0x1f72   :  { %1587 = vpow2.f32 %v1346_v4 }
0x1f73   :  { %v1490_v6 = vpop.f32.mrf.mxu1 }
0x1f7f   :  { %v1588_v9 = vpop.eup %1587 }
0x1f80   :  { %v952_v10 = vadd.f32 1.0, %v1588_v9  ;;  %v1224_v9 = vld [vmem:[%s2076_s2] sm:$0xff] }
0x1f82   :  { %1589 = vrcp.f32 %v952_v10 }
0x1f8f   :  { %v1590_v11 = vpop.eup %1589 }
0x1f90   :  { %v955_v12 = vmul.f32 2.0, %v1590_v11  ;;  %v957_v19 = vmul.f32 %v1590_v11, %v889_v55 }
0x1f92   :  { %v1347_v14 = vadd.f32 -1.0, %v955_v12 }
0x1f94   :  { %959 = vrot.lane.b32.xlu0 %v1347_v14, %s1618_s29 }
0x1f98   :  { %585 = vrot.lane.b32.xlu0 %v1790_v28, %s1620_s10 }
0x1f9c   :  { %741 = vrot.lane.b32.xlu0 %v1826_v13, %s1620_s10 }
0x1fa0   :  { %897 = vrot.lane.b32.xlu0 %v889_v55, %s1620_s10 }
0x2006   :  { %v960_v16 = vpop.permute.xlu0 %959 }
0x2007   :  { %v962_v17 = vmul.f32 %v1590_v11, %v960_v16 }
0x2009   :  { %964 = vrot.lane.b32.xlu1 %v962_v17, %s1619_s30 }
0x200a   :  { %v586_v28 = vpop.permute.xlu0 %585 }
0x200b   :  { %588 = vst.msk [vmem:[#allocation2] sm:$0xff] %vm64_vm1, %v586_v28  ;;  %v1226_v28 = vld [vmem:[%s2076_s2 + $0x10] sm:$0xff] }
0x200d   :  { %663 = vrot.lane.b32.xlu1 %v1808_v50, %s1620_s10 }
0x200e   :  { %v742_v13 = vpop.permute.xlu0 %741 }
0x200f   :  { %744 = vst.msk [vmem:[#allocation2 + $0x10] sm:$0xff] %vm64_vm1, %v742_v13  ;;  %v1227_v13 = vld [vmem:[%s2076_s2 + $0x18] sm:$0xff] }
0x2011   :  { %819 = vrot.lane.b32.xlu1 %v1843_v32, %s1620_s10 }
0x2012   :  { %v898_v18 = vpop.permute.xlu0 %897  ;;  %v973_v23 = vld [vmem:[#allocation2] sm:$0xff] }
0x2013   :  { %900 = vst.msk [vmem:[#allocation2 + $0x20] sm:$0xff] %vm64_vm1, %v898_v18  ;;  %v1228_v18 = vld [vmem:[%s2076_s2 + $0x20] sm:$0xff] }
0x2016   :  { %v975_v25 = vld [vmem:[#allocation2 + $0x10] sm:$0xff] }
0x201a   :  { %v977_v8 = vld [vmem:[#allocation2 + $0x20] sm:$0xff] }
0x207b   :  { %v965_v2 = vpop.permute.xlu1 %964 }
0x207c   :  { %v967_v20 = vadd.f32 %v965_v2, %v957_v19  ;;  %v1225_v19 = vld [vmem:[%s2076_s2 + $0x8] sm:$0xff] }
0x207d   :  { %v1229_v2 = vld [vmem:[%s2076_s2 + $0x28] sm:$0xff] }
0x207e   :  { %969 = vrot.lane.b32.xlu1 %v967_v20, %s1620_s10 }
0x207f   :  { %v664_v21 = vpop.permute.xlu1 %663 }
0x2080   :  { %666 = vst.msk [vmem:[#allocation2 + $0x8] sm:$0xff] %vm64_vm1, %v664_v21 }
0x2083   :  { %v820_v22 = vpop.permute.xlu1 %819 }
0x2084   :  { %822 = vst.msk [vmem:[#allocation2 + $0x18] sm:$0xff] %vm64_vm1, %v820_v22 }
0x2087   :  { %v974_v50 = vld [vmem:[#allocation2 + $0x8] sm:$0xff] }
0x2088   :  { %v979_v24 = vpack.c.bf16 %v974_v50, %v973_v23 }
0x208a   :  { %1496 = vmatmul.mubr.msk.bf16.vlgmr.msra.gmra.mxu0 %vm64_vm1, %v979_v24 }
0x208b   :  { %1499 = vmatprep.mubr.msk.bf16.mxu0 %vm1616_vm0, %v1615_v0  ;;  %v976_v7 = vld [vmem:[#allocation2 + $0x18] sm:$0xff] }
0x208c   :  { %v980_v26 = vpack.c.bf16 %v976_v7, %v975_v25 }
0x2092   :  { %1500 = vmatmul.mubr.msk.bf16.gmra.mxu0 %vm64_vm1, %v980_v26 }
0x2093   :  { %1503 = vmatprep.mubr.msk.bf16.mxu0 %vm1616_vm0, %v1615_v0 }
0x20f0   :  { %v970_v27 = vpop.permute.xlu1 %969 }
0x20f1   :  { %972 = vst.msk [vmem:[#allocation2 + $0x28] sm:$0xff] %vm64_vm1, %v970_v27 }
0x20f8   :  { %v978_v29 = vld [vmem:[#allocation2 + $0x28] sm:$0xff] }
0x20f9   :  { %v981_v30 = vpack.c.bf16 %v978_v29, %v977_v8 }
0x20fb   :  { %1504 = vmatmul.mubr.msk.bf16.gmra.mxu0 %vm64_vm1, %v981_v30 }
0x214a   :  { %v1043_v32 = vpop.f32.mrf.mxu0 }
0x214b   :  { %v1892_v33 = vadd.f32 %v1348_v31, %v1043_v32 }
0x214c   :  { %v1497_v34 = vpop.f32.mrf.mxu0 }
0x214d   :  { %1068 = vmax.xlane.f32.xlu0 %v1892_v33 }
0x214e   :  { %v1046_v35 = vpop.f32.mrf.mxu0 }
0x214f   :  { %v1895_v0 = vadd.f32 %v1348_v31, %v1046_v35 }
0x2150   :  { %v1498_v36 = vpop.f32.mrf.mxu0 }
0x2151   :  { %1070 = vmax.xlane.f32.xlu1 %v1895_v0 }
0x2152   :  { %v1051_v37 = vpop.f32.mrf.mxu0 }
0x2153   :  { %v1898_v38 = vadd.f32 %v1348_v31, %v1051_v37 }
0x2154   :  { %v1501_v39 = vpop.f32.mrf.mxu0 }
0x2155   :  { %1072 = vmax.xlane.f32.xlu0 %v1898_v38 }
0x2156   :  { %v1054_v40 = vpop.f32.mrf.mxu0 }
0x2157   :  { %v1901_v41 = vadd.f32 %v1348_v31, %v1054_v40 }
0x2158   :  { %v1502_v42 = vpop.f32.mrf.mxu0 }
0x2159   :  { %1074 = vmax.xlane.f32.xlu0 %v1901_v41 }
0x21bb   :  { %v1059_v43 = vpop.f32.mrf.mxu0 }
0x21bc   :  { %v1904_v44 = vadd.f32 %v1348_v31, %v1059_v43 }
0x21bd   :  { %v1505_v45 = vpop.f32.mrf.mxu0 }
0x21be   :  { %1076 = vmax.xlane.f32.xlu1 %v1904_v44 }
0x21bf   :  { %v1062_v46 = vpop.f32.mrf.mxu0 }
0x21c0   :  { %v1907_v47 = vadd.f32 %v1348_v31, %v1062_v46 }
0x21c1   :  { %v1506_v48 = vpop.f32.mrf.mxu0 }
0x21c2   :  { %1078 = vmax.xlane.f32.xlu0 %v1907_v47 }
0x21d6   :  { %v1912_v52 = vpop.xlane.xlu0 %1068 }
0x21d7   :  { %vm1080_vm2 = vcmp.eq.f32.partialorder %v1892_v33, %v1912_v52  ;;  %v1176_v25 = vsub.f32 %v1892_v33, %v1912_v52 }
0x21d8   :  { %v1917_v53 = vsel %vm1080_vm2, %v1910_v51, 128 }
0x21d9   :  { %v1093_v54 = vshra.s32 %v1917_v53, 16  ;;  %v1182_v27 = vmul.f32 1.442695, %v1176_v25 }
0x21da   :  { %v1920_v55 = vpop.xlane.xlu1 %1070 }
0x21db   :  { %vm1081_vm3 = vcmp.eq.f32.partialorder %v1895_v0, %v1920_v55  ;;  %v1924_v56 = vcvt.s32.f32 %v1093_v54  ;;  %v1177_v24 = vsub.f32 %v1895_v0, %v1920_v55 }
0x21dc   :  { %v1927_v57 = vsel %vm1081_vm3, %v1910_v51, 128 }
0x21dd   :  { %1096 = vmin.xlane.f32.xlu1 %v1924_v56  ;;  %v1107_v58 = vshra.s32 %v1927_v57, 16  ;;  %v1184_v7 = vmul.f32 1.442695, %v1177_v24  ;;  %v1106_v40 = vand.u32 65535, %v1927_v57 }
0x21de   :  { %v1931_v59 = vpop.xlane.xlu0 %1072 }
0x21df   :  { %vm1082_vm4 = vcmp.eq.f32.partialorder %v1898_v38, %v1931_v59  ;;  %v1935_v60 = vcvt.s32.f32 %v1107_v58  ;;  %1591 = vpow2.f32 %v1184_v7  ;;  %v1178_v8 = vsub.f32 %v1898_v38, %v1931_v59 }
0x21e0   :  { %v1088_v61 = vsel %vm1082_vm4, %v1910_v51, 128  ;;  %1593 = vpow2.f32 %v1182_v27  ;;  %v1108_v46 = vcvt.s32.f32 %v1106_v40  ;;  %vm1284_vm4 = vcmp.eq.s32.totalorder %v1910_v51, 0 }
0x21e1   :  { %1110 = vmin.xlane.f32.xlu0 %v1935_v60  ;;  %v1121_v62 = vshra.s32 %v1088_v61, 16  ;;  %v1120_v21 = vand.u32 65535, %v1088_v61  ;;  %v1186_v30 = vmul.f32 1.442695, %v1178_v8 }
0x21e2   :  { %v1939_v63 = vpop.xlane.xlu0 %1074 }
0x21e3   :  { %vm1083_vm5 = vcmp.eq.f32.partialorder %v1901_v41, %v1939_v63  ;;  %v1123_v3 = vcvt.s32.f32 %v1121_v62  ;;  %v1122_v23 = vcvt.s32.f32 %v1120_v21  ;;  %v1179_v31 = vsub.f32 %v1901_v41, %v1939_v63 }
0x21e4   :  { %v1944_v4 = vsel %vm1083_vm5, %v1910_v51, 128  ;;  %vm1287_vm5 = vcmp.eq.s32.totalorder %v1910_v51, 1 }
0x21e5   :  { %1124 = vmin.xlane.f32.xlu1 %v1123_v3  ;;  %v1135_v5 = vshra.s32 %v1944_v4, 16  ;;  %v1188_v34 = vmul.f32 1.442695, %v1179_v31 }
0x21e7   :  { %v1947_v6 = vcvt.s32.f32 %v1135_v5 }
0x21e9   :  { %1138 = vmin.xlane.f32.xlu0 %v1947_v6 }
0x21ec   :  { %v1592_v35 = vpop.eup %1591 }
0x21ed   :  { %v1594_v42 = vpop.eup %1593 }
0x21f6   :  { %1231 = vperm.xlu1 %1513, %v1224_v9  }
0x2247   :  { %v1953_v10 = vpop.xlane.xlu1 %1076 }
0x2248   :  { %vm1084_vm6 = vcmp.eq.f32.partialorder %v1904_v44, %v1953_v10  ;;  %v1180_v36 = vsub.f32 %v1904_v44, %v1953_v10 }
0x2249   :  { %v1958_v11 = vsel %vm1084_vm6, %v1910_v51, 128  ;;  %vm1290_vm6 = vcmp.eq.s32.totalorder %v1910_v51, 2 }
0x224a   :  { %v1149_v12 = vshra.s32 %v1958_v11, 16  ;;  %v1190_v43 = vmul.f32 1.442695, %v1180_v36  ;;  %v1148_v5 = vand.u32 65535, %v1958_v11 }
0x224b   :  { %v1961_v14 = vpop.xlane.xlu0 %1078 }
0x224c   :  { %vm1085_vm7 = vcmp.eq.f32.partialorder %v1907_v47, %v1961_v14  ;;  %v1965_v1 = vcvt.s32.f32 %v1149_v12  ;;  %v1181_v26 = vsub.f32 %v1907_v47, %v1961_v14  ;;  %v1150_v12 = vcvt.s32.f32 %v1148_v5 }
0x224d   :  { %v1968_v15 = vsel %vm1085_vm7, %v1910_v51, 128  ;;  %vm1293_vm7 = vcmp.eq.s32.totalorder %v1910_v51, 3 }
0x224e   :  { %1152 = vmin.xlane.f32.xlu1 %v1965_v1  ;;  %v1163_v16 = vshra.s32 %v1968_v15, 16  ;;  %v1192_v29 = vmul.f32 1.442695, %v1181_v26 }
0x2250   :  { %v1972_v17 = vcvt.s32.f32 %v1163_v16  ;;  %1595 = vpow2.f32 %v1192_v29  ;;  %v1162_v16 = vand.u32 65535, %v1968_v15 }
0x2251   :  { %1597 = vpow2.f32 %v1186_v30 }
0x2252   :  { %1166 = vmin.xlane.f32.xlu0 %v1972_v17  ;;  %1599 = vpow2.f32 %v1188_v34 }
0x2253   :  { %1601 = vpow2.f32 %v1190_v43 }
0x225d   :  { %v1596_v45 = vpop.eup %1595 }
0x225e   :  { %v1598_v48 = vpop.eup %1597 }
0x225f   :  { %1237 = vperm.xlu1 %1513, %v1226_v28   ;;  %v1600_v54 = vpop.eup %1599 }
0x2260   :  { %v1602_v61 = vpop.eup %1601 }
0x2263   :  { %1240 = vperm.xlu1 %1513, %v1227_v13  }
0x2266   :  { %v1990_v20 = vpop.xlane.xlu1 %1096 }
0x2267   :  { %1243 = vperm.xlu1 %1513, %v1228_v18   ;;  %vm1098_vm11 = vcmp.eq.f32.partialorder %v1924_v56, %v1990_v20  ;;  %v1164_v18 = vcvt.s32.f32 %v1162_v16  ;;  %v1103_v27 = vcvt.f32.s32 %v1990_v20 }
0x2268   :  { %1234 = vperm.xlu0 %1514, %v1225_v19  }
0x2269   :  { %v1104_v30 = vshll.u32 %v1103_v27, 16 }
0x226a   :  { %v2011_v39 = vpop.xlane.xlu0 %1110 }
0x226b   :  { %1246 = vperm.xlu1 %1513, %v1229_v2   ;;  %vm1112_vm10 = vcmp.eq.f32.partialorder %v1935_v60, %v2011_v39  ;;  %v1134_v2 = vand.u32 65535, %v1944_v4  ;;  %v1117_v25 = vcvt.f32.s32 %v2011_v39 }
0x226c   :  { %v1113_v49 = vsel %vm1112_vm10, %v1108_v46, inf  ;;  %vm1302_vm10 = vcmp.eq.s32.totalorder %v1910_v51, 6 }
0x226e   :  { %v1992_v22 = vpop.xlane.xlu1 %1124 }
0x226f   :  { %vm1126_vm8 = vcmp.eq.f32.partialorder %v1123_v3, %v1992_v22 }
0x2270   :  { %v1995_v50 = vsel %vm1126_vm8, %v1122_v23, inf  ;;  %vm1296_vm8 = vcmp.eq.s32.totalorder %v1910_v51, 4 }
0x2272   :  { %v1232_v32 = vpop.permute.xlu1 %1231  ;;  %v2021_v60 = vpop.xlane.xlu0 %1138 }
0x2273   :  { %vm1248_vm9 = vcmp.eq.s32.totalorder %v1910_v51, %v1232_v32  ;;  %vm1140_vm1 = vcmp.eq.f32.partialorder %v1947_v6, %v2021_v60 }
0x2274   :  { %v1254_v37 = vsel %vm1248_vm9, %v1892_v33, 0.0  ;;  %v1092_v33 = vand.u32 65535, %v1917_v53  ;;  %vm1299_vm9 = vcmp.eq.s32.totalorder %v1910_v51, 5 }
0x2276   :  { %v1094_v57 = vcvt.s32.f32 %v1092_v33 }
0x2278   :  { %v1099_v58 = vsel %vm1098_vm11, %v1094_v57, inf }
0x2287   :  { %1196 = vadd.xlane.f32.xlu0 %v1592_v35 }
0x228b   :  { %1260 = vadd.xlane.f32.xlu0 %v1254_v37 }
0x228f   :  { %1194 = vadd.xlane.f32.xlu1 %v1594_v42  ;;  %1204 = vadd.xlane.f32.xlu0 %v1596_v45  ;;  %v1131_v45 = vcvt.f32.s32 %v1992_v22 }
0x2291   :  { %v1132_v57 = vshll.u32 %v1131_v45, 16 }
0x2293   :  { %1198 = vadd.xlane.f32.xlu1 %v1598_v48  ;;  %1114 = vmin.xlane.f32.xlu0 %v1113_v49 }
0x2297   :  { %1200 = vadd.xlane.f32.xlu1 %v1600_v54 }
0x229b   :  { %1100 = vmin.xlane.f32.xlu1 %v1099_v58  ;;  %v1145_v58 = vcvt.f32.s32 %v2021_v60 }
0x229f   :  { %1202 = vadd.xlane.f32.xlu1 %v1602_v61 }
0x22d7   :  { %v2019_v62 = vpop.xlane.xlu1 %1152 }
0x22d8   :  { %vm1154_vm13 = vcmp.eq.f32.partialorder %v1965_v1, %v2019_v62  ;;  %v1159_v61 = vcvt.f32.s32 %v2019_v62 }
0x22d9   :  { %v1155_v28 = vsel %vm1154_vm13, %v1150_v12, inf }
0x22da   :  { %v1160_v60 = vshll.u32 %v1159_v61, 16 }
0x22db   :  { %v1238_v3 = vpop.permute.xlu1 %1237  ;;  %v2028_v56 = vpop.xlane.xlu0 %1166 }
0x22dc   :  { %vm1250_vm12 = vcmp.eq.s32.totalorder %v1910_v51, %v1238_v3  ;;  %vm1168_vm14 = vcmp.eq.f32.partialorder %v1972_v17, %v2028_v56  ;;  %v1136_v17 = vcvt.s32.f32 %v1134_v2 }
0x22dd   :  { %v1256_v53 = vsel %vm1250_vm12, %v1898_v38, 0.0  ;;  %v1169_v38 = vsel %vm1168_vm14, %v1164_v18, inf }
0x22de   :  { %1264 = vadd.xlane.f32.xlu0 %v1256_v53  ;;  %v1141_v21 = vsel %vm1140_vm1, %v1136_v17, inf  ;;  %v1173_v53 = vcvt.f32.s32 %v2028_v56 }
0x22df   :  { %v1241_v9 = vpop.permute.xlu1 %1240 }
0x22e0   :  { %vm1251_vm2 = vcmp.eq.s32.totalorder %v1910_v51, %v1241_v9  ;;  %v1174_v2 = vshll.u32 %v1173_v53, 16 }
0x22e2   :  { %1156 = vmin.xlane.f32.xlu0 %v1155_v28 }
0x22e3   :  { %v1244_v11 = vpop.permute.xlu1 %1243  ;;  %v1235_v13 = vpop.permute.xlu0 %1234 }
0x22e4   :  { %vm1249_vm15 = vcmp.eq.s32.totalorder %v1910_v51, %v1235_v13  ;;  %vm1252_vm3 = vcmp.eq.s32.totalorder %v1910_v51, %v1244_v11 }
0x22e5   :  { %v1255_v19 = vsel %vm1249_vm15, %v1895_v0, 0.0  ;;  %v1257_v0 = vsel %vm1251_vm2, %v1901_v41, 0.0  ;;  %v1258_v4 = vsel %vm1252_vm3, %v1904_v44, 0.0  ;;  %v1118_v41 = vshll.u32 %v1117_v25, 16 }
0x22e6   :  { %1170 = vmin.xlane.f32.xlu0 %v1169_v38  ;;  %1262 = vadd.xlane.f32.xlu1 %v1255_v19 }
0x22e7   :  { %v1247_v1 = vpop.permute.xlu1 %1246 }
0x22e8   :  { %vm1253_vm0 = vcmp.eq.s32.totalorder %v1910_v51, %v1247_v1  ;;  %v1146_v1 = vshll.u32 %v1145_v58, 16 }
0x22e9   :  { %v1259_v15 = vsel %vm1253_vm0, %v1907_v47, 0.0 }
0x22ea   :  { %1270 = vadd.xlane.f32.xlu0 %v1259_v15  ;;  %1128 = vmin.xlane.f32.xlu1 %v1995_v50 }
0x22ee   :  { %1142 = vmin.xlane.f32.xlu1 %v1141_v21 }
0x22f2   :  { %1266 = vadd.xlane.f32.xlu1 %v1257_v0 }
0x22f6   :  { %1268 = vadd.xlane.f32.xlu1 %v1258_v4 }
0x2310   :  { %v1197_v47 = vpop.xlane.xlu0 %1196 }
0x2311   :  { %1603 = vlog2.f32 %v1197_v47 }
0x2314   :  { %v2045_v23 = vpop.xlane.xlu0 %1260 }
0x2318   :  { %v1195_v50 = vpop.xlane.xlu1 %1194  ;;  %v1205_v24 = vpop.xlane.xlu0 %1204 }
0x2319   :  { %1605 = vlog2.f32 %v1195_v50 }
0x231c   :  { %v1199_v7 = vpop.xlane.xlu1 %1198  ;;  %v1115_v6 = vpop.xlane.xlu0 %1114 }
0x231d   :  { %v1116_v8 = vcvt.f32.s32 %v1115_v6  ;;  %1607 = vlog2.f32 %v1199_v7 }
0x231e   :  { %v1604_v40 = vpop.eup %1603 }
0x231f   :  { %v1119_v32 = vadd.s32 %v1118_v41, %v1116_v8  ;;  %v1209_v48 = vmul.f32 0.6931472, %v1604_v40 }
0x2320   :  { %v1201_v26 = vpop.xlane.xlu1 %1200 }
0x2321   :  { %v1279_v35 = vcvt.s32.f32 %v1119_v32  ;;  %1609 = vlog2.f32 %v1201_v26  ;;  %v1219_v12 = vadd.f32 %v1209_v48, %v1920_v55 }
0x2324   :  { %v1101_v29 = vpop.xlane.xlu1 %1100 }
0x2325   :  { %v1102_v31 = vcvt.f32.s32 %v1101_v29 }
0x2326   :  { %v1606_v42 = vpop.eup %1605 }
0x2327   :  { %v1105_v44 = vadd.s32 %v1104_v30, %v1102_v31  ;;  %v1207_v49 = vmul.f32 0.6931472, %v1606_v42 }
0x2328   :  { %v1203_v20 = vpop.xlane.xlu1 %1202 }
0x2329   :  { %v1278_v34 = vcvt.s32.f32 %v1105_v44  ;;  %1611 = vlog2.f32 %v1203_v20  ;;  %v1218_v9 = vadd.f32 %v1207_v49, %v1912_v52 }
0x232a   :  { %1613 = vlog2.f32 %v1205_v24  ;;  %v1608_v33 = vpop.eup %1607 }
0x232b   :  { %v1285_v36 = vsel %vm1284_vm4, %v1278_v34, 0.0  ;;  %v1211_v22 = vmul.f32 0.6931472, %v1608_v33  ;;  %v1272_v56 = vsub.f32 %v2045_v23, %v1218_v9 }
0x232c   :  { %v1288_v37 = vsel %vm1287_vm5, %v1279_v35, %v1285_v36 }
0x232d   :  { %v1220_v21 = vadd.f32 %v1211_v22, %v1931_v59 }
0x232e   :  { %v1610_v54 = vpop.eup %1609 }
0x232f   :  { %v1213_v28 = vmul.f32 0.6931472, %v1610_v54 }
0x2331   :  { %v1221_v4 = vadd.f32 %v1213_v28, %v1939_v63 }
0x2336   :  { %v1612_v13 = vpop.eup %1611 }
0x2337   :  { %v1614_v17 = vpop.eup %1613  ;;  %v1215_v55 = vmul.f32 0.6931472, %v1612_v13 }
0x2338   :  { %v1217_v25 = vmul.f32 0.6931472, %v1614_v17 }
0x2339   :  { %v1222_v63 = vadd.f32 %v1215_v55, %v1953_v10 }
0x233a   :  { %v1223_v44 = vadd.f32 %v1217_v25, %v1961_v14 }
0x2367   :  { %v1265_v39 = vpop.xlane.xlu0 %1264 }
0x2368   :  { %v1274_v23 = vsub.f32 %v1265_v39, %v1220_v21 }
0x236b   :  { %v1157_v43 = vpop.xlane.xlu0 %1156 }
0x236c   :  { %v1158_v11 = vcvt.f32.s32 %v1157_v43 }
0x236e   :  { %v1161_v0 = vadd.s32 %v1160_v60, %v1158_v11 }
0x236f   :  { %v1263_v46 = vpop.xlane.xlu1 %1262  ;;  %v1171_v3 = vpop.xlane.xlu0 %1170 }
0x2370   :  { %v1273_v18 = vsub.f32 %v1263_v46, %v1219_v12  ;;  %v1172_v38 = vcvt.f32.s32 %v1171_v3  ;;  %v1282_v8 = vcvt.s32.f32 %v1161_v0 }
0x2372   :  { %v1289_v47 = vadd.f32 %v1273_v18, %v1272_v56  ;;  %v1175_v50 = vadd.s32 %v1174_v2, %v1172_v38 }
0x2373   :  { %v1129_v5 = vpop.xlane.xlu1 %1128  ;;  %v1271_v30 = vpop.xlane.xlu0 %1270 }
0x2374   :  { %v1130_v16 = vcvt.f32.s32 %v1129_v5  ;;  %v1283_v59 = vcvt.s32.f32 %v1175_v50  ;;  %v1292_v29 = vadd.f32 %v1289_v47, %v1274_v23 }
0x2376   :  { %v1133_v19 = vadd.s32 %v1132_v57, %v1130_v16 }
0x2377   :  { %v1143_v62 = vpop.xlane.xlu1 %1142 }
0x2378   :  { %v1280_v15 = vcvt.s32.f32 %v1133_v19  ;;  %v1144_v52 = vcvt.f32.s32 %v1143_v62 }
0x237a   :  { %v1291_v24 = vsel %vm1290_vm6, %v1280_v15, %v1288_v37  ;;  %v1147_v7 = vadd.s32 %v1146_v1, %v1144_v52  ;;  %v1277_v37 = vsub.f32 %v1271_v30, %v1223_v44 }
0x237b   :  { %v1267_v6 = vpop.xlane.xlu1 %1266 }
0x237c   :  { %v1281_v26 = vcvt.s32.f32 %v1147_v7  ;;  %v1275_v27 = vsub.f32 %v1267_v6, %v1221_v4 }
0x237e   :  { %v1294_v41 = vsel %vm1293_vm7, %v1281_v26, %v1291_v24  ;;  %v1295_v34 = vadd.f32 %v1292_v29, %v1275_v27 }
0x237f   :  { %v1297_v31 = vsel %vm1296_vm8, %v1282_v8, %v1294_v41  ;;  %v1269_v32 = vpop.xlane.xlu1 %1268 }
0x2380   :  { %v1276_v35 = vsub.f32 %v1269_v32, %v1222_v63  ;;  %v1300_v36 = vsel %vm1299_vm9, %v1283_v59, %v1297_v31 }
0x2382   :  { %v1298_v20 = vadd.f32 %v1295_v34, %v1276_v35 }
0x2384   :  { %v1301_v39 = vadd.f32 %v1298_v20, %v1277_v37 }
0x2386   :  { %v1303_v40 = vsel %vm1302_vm10, %v1301_v39, %v1300_v36 }
0x2387   :  { %1304 = vst [vmem:[%s2077_s7] sm:$0xff] %v1303_v40 }

</bundles_post_ra>
